<compile_context>
chip_gen: v5e
topology: v5e:2x2
jax: 0.10.0
libtpu: 0.0.40
codegen_flags: <defaults>
</compile_context>

<pallas_src>
import math
from functools import partial

import jax
import jax.numpy as jnp
from jax import lax
from jax.experimental import pallas as pl
from jax.experimental.pallas import tpu as pltpu

_NEG_INIT = -1e30          # "minus infinity" for the online-softmax running max
_DIAG_PENALTY = 1e9        # matches the PyTorch module's 1e9 one-hot mask


def _simclr_kernel(qa_q_ref, qb_q_ref, qa_k_ref, qb_k_ref,     # inputs (bf16, pre-normalized)
                   loss_ref, acc_ref,                          # outputs (SMEM scalars)
                   m_a, l_a, tgt_r, v_ab, i_ab,                # per-query-tile state (row layout)
                   m_b, l_b, tgt_l,                            # loss_b state (lane layout, all key tiles)
                   sums,                                       # SMEM: [loss_a raw sum, correct count]
                   *, batch):
    i = pl.program_id(0)       # query-tile index (outer loop)
    j = pl.program_id(1)       # key-tile index   (inner loop)
    ni = pl.num_programs(0)
    nj = pl.num_programs(1)
    T = qa_q_ref.shape[0]

    # ---- global init on the very first grid step ----------------------------
    @pl.when(jnp.logical_and(i == 0, j == 0))
    def _():
        m_b[...] = jnp.full(m_b.shape, _NEG_INIT, jnp.float32)
        l_b[...] = jnp.zeros(l_b.shape, jnp.float32)
        sums[0] = jnp.float32(0.0)
        sums[1] = jnp.float32(0.0)

    # ---- per-query-tile init at the start of every inner sweep --------------
    @pl.when(j == 0)
    def _():
        m_a[...] = jnp.full(m_a.shape, _NEG_INIT, jnp.float32)
        l_a[...] = jnp.zeros(l_a.shape, jnp.float32)
        v_ab[...] = jnp.full(v_ab.shape, _NEG_INIT, jnp.float32)
        i_ab[...] = jnp.zeros(i_ab.shape, jnp.int32)

    # Inputs are already L2-normalized * sqrt(1/tau) and bf16.
    qa_i = qa_q_ref[...]
    qb_i = qb_q_ref[...]
    qa_j = qa_k_ref[...]
    qb_j = qb_k_ref[...]

    # 3 MXU matmuls (bf16 x bf16 -> f32); dim-1-with-dim-1 contraction = A @ B^T
    # without an explicit operand transpose feeding the MXU.
    dn = (((1,), (1,)), ((), ()))
    s_ab = lax.dot_general(qa_i, qb_j, dn, preferred_element_type=jnp.float32)
    s_aa = lax.dot_general(qa_i, qa_j, dn, preferred_element_type=jnp.float32)
    s_bb = lax.dot_general(qb_i, qb_j, dn, preferred_element_type=jnp.float32)

    col = lax.broadcasted_iota(jnp.int32, (T, T), 1)

    def row_update(s, rm):                 # loss_a: online logsumexp over rows
        m_old = m_a[...]
        m_new = jnp.maximum(m_old, rm)
        l_a[...] = (l_a[...] * jnp.exp(m_old - m_new)
                    + jnp.sum(jnp.exp(s - m_new), axis=1, keepdims=True))
        m_a[...] = m_new

    def col_update(s, cm):                 # loss_b: online logsumexp over columns
        m_old = m_b[j]
        m_new = jnp.maximum(m_old, cm)
        l_b[j] = (l_b[j] * jnp.exp(m_old - m_new)
                  + jnp.sum(jnp.exp(s - m_new), axis=0, keepdims=True))
        m_b[j] = m_new

    # ab tile: rows -> loss_a (query tile i); columns -> loss_b (key tile j),
    # since logits_ba[r, :] == logits_ab[:, r].
    rm_ab = jnp.max(s_ab, axis=1, keepdims=True)
    row_update(s_ab, rm_ab)
    col_update(s_ab, jnp.max(s_ab, axis=0, keepdims=True))

    # accuracy: running (value, first-index) argmax over the ab half
    idx = jnp.min(jnp.where(s_ab == rm_ab, col, jnp.int32(T)),
                  axis=1, keepdims=True) + j * T
    better = rm_ab > v_ab[...]             # strict > keeps the earlier column
    i_ab[...] = jnp.where(better, idx, i_ab[...])
    v_ab[...] = jnp.where(better, rm_ab, v_ab[...])

    # self-similarity tiles: only diagonal tiles pay for the mask work
    @pl.when(i != j)
    def _():
        row_update(s_aa, jnp.max(s_aa, axis=1, keepdims=True))
        col_update(s_bb, jnp.max(s_bb, axis=0, keepdims=True))

    @pl.when(i == j)
    def _():
        row = lax.broadcasted_iota(jnp.int32, (T, T), 0)
        eye = col == row
        pen = jnp.where(eye, jnp.float32(_DIAG_PENALTY), jnp.float32(0.0))
        s_aa_m = s_aa - pen
        s_bb_m = s_bb - pen
        row_update(s_aa_m, jnp.max(s_aa_m, axis=1, keepdims=True))
        col_update(s_bb_m, jnp.max(s_bb_m, axis=0, keepdims=True))
        diag = jnp.where(eye, s_ab, 0.0)   # target logit ab[r, r]
        tgt_r[...] = jnp.sum(diag, axis=1, keepdims=True)    # (T, 1)
        tgt_l[j] = jnp.sum(diag, axis=0, keepdims=True)      # (1, T)

    # ---- end of inner sweep: fold this query tile's loss_a + accuracy -------
    @pl.when(j == nj - 1)
    def _():
        lse_a = m_a[...] + jnp.log(l_a[...])
        sums[0] = sums[0] + jnp.sum(lse_a - tgt_r[...])
        labels = i * T + lax.broadcasted_iota(jnp.int32, (T, 1), 0)
        correct = jnp.logical_and(v_ab[...] == m_a[...], i_ab[...] == labels)
        sums[1] = sums[1] + jnp.sum(correct.astype(jnp.float32))

    # ---- final grid step: fold loss_b and write the outputs -----------------
    @pl.when(jnp.logical_and(i == ni - 1, j == nj - 1))
    def _():
        lse_b = m_b[...] + jnp.log(l_b[...])
        loss_b_sum = jnp.sum(lse_b - tgt_l[...])
        invb = 1.0 / jnp.float32(batch)
        loss_ref[0, 0] = 0.5 * (sums[0] + loss_b_sum) * invb
        acc_ref[0, 0] = 100.0 * sums[1] * invb


# ----------------------------------------------------------------------------
# Wrapper
# ----------------------------------------------------------------------------

def _device_gen():
    try:
        kind = jax.devices()[0].device_kind.lower()
    except Exception:
        return 6
    for g in (7, 6, 5, 4, 3, 2):
        if f"v{g}" in kind:
            return g
    return 6


def _vmem_limit_bytes():
    gen = _device_gen()
    if gen >= 7:
        return 48 << 20     # v7x: 64 MiB physical per TensorCore
    if gen >= 4:
        return 64 << 20     # v4/v5e/v6e: 128 MiB physical
    return 12 << 20


def _vmem_estimate(T, D, B):
    inputs = 4 * 2 * T * D * 2            # 4 bf16 (T, D) blocks, double-buffered
    logits = 8 * T * T * 4                # f32 logits + exp temporaries
    row_stats = 5 * T * 128 * 4           # (T, 1) scratch, lane-padded to 128
    col_stats = 3 * 8 * max(B, 128) * 4   # (n, 1, T) scratch, sublane-padded to 8
    return inputs + logits + row_stats + col_stats + (2 << 20)


def _pick_tile(B, D, budget):
    for t in (512, 256, 128, 64, 32, 16, 8):
        if B % t == 0 and _vmem_estimate(t, D, B) <= budget:
            return t
    # TODO(synk): pad ragged B up to a multiple of 8/128 and mask the padded
    # key columns / exclude padded query rows, instead of one full-size tile.
    return B


def _normalize_and_scale(x, scale):
    """L2-normalize rows, fold sqrt(1/tau) in, cast to bf16 (MXU operand dtype)."""
    x = x.astype(jnp.float32)
    ss = jnp.sum(x * x, axis=-1, keepdims=True)
    return (x * (lax.rsqrt(jnp.maximum(ss, 1e-24)) * scale)).astype(jnp.bfloat16)


def inter_simclr_loss(q_a, q_b, temperature=0.1, tile=None):
    """Pallas TPU implementation of Inter_SIMCLRLoss.forward (single device)."""
    assert q_a.shape == q_b.shape and q_a.ndim == 2
    B, D = q_a.shape
    vmem_limit = _vmem_limit_bytes()
    T = _pick_tile(B, D, vmem_limit // 2) if tile is None else int(tile)
    assert B % T == 0, (B, T)
    n = B // T

    scale = float(math.sqrt(1.0 / float(temperature)))
    qa_n = _normalize_and_scale(q_a, scale)
    qb_n = _normalize_and_scale(q_b, scale)

    kernel = partial(_simclr_kernel, batch=B)

    grid_spec = pltpu.PrefetchScalarGridSpec(
        num_scalar_prefetch=0,
        grid=(n, n),
        in_specs=[
            pl.BlockSpec((T, D), lambda i, j: (i, 0)),   # q_a, query rows
            pl.BlockSpec((T, D), lambda i, j: (i, 0)),   # q_b, query rows
            pl.BlockSpec((T, D), lambda i, j: (j, 0)),   # q_a, key rows
            pl.BlockSpec((T, D), lambda i, j: (j, 0)),   # q_b, key rows
        ],
        out_specs=[
            pl.BlockSpec((1, 1), lambda i, j: (0, 0),
                         memory_space=pltpu.MemorySpace.SMEM),
            pl.BlockSpec((1, 1), lambda i, j: (0, 0),
                         memory_space=pltpu.MemorySpace.SMEM),
        ],
        scratch_shapes=[
            pltpu.VMEM((T, 1), jnp.float32),      # m_a   (running max, loss_a)
            pltpu.VMEM((T, 1), jnp.float32),      # l_a   (running sumexp)
            pltpu.VMEM((T, 1), jnp.float32),      # tgt_r (ab diag, row layout)
            pltpu.VMEM((T, 1), jnp.float32),      # v_ab  (running max, ab half)
            pltpu.VMEM((T, 1), jnp.int32),        # i_ab  (running argmax, ab half)
            pltpu.VMEM((n, 1, T), jnp.float32),   # m_b   (running max, loss_b)
            pltpu.VMEM((n, 1, T), jnp.float32),   # l_b
            pltpu.VMEM((n, 1, T), jnp.float32),   # tgt_l (ab diag, lane layout)
            pltpu.SMEM((2,), jnp.float32),        # [loss_a raw sum, correct count]
        ],
    )

    loss, acc = pl.pallas_call(
        kernel,
        out_shape=(jax.ShapeDtypeStruct((1, 1), jnp.float32),
                   jax.ShapeDtypeStruct((1, 1), jnp.float32)),
        grid_spec=grid_spec,
        compiler_params=pltpu.CompilerParams(
            # loss_b state accumulates across the outer axis too -> sequential grid.
            # TODO(synk): v7x megacore: privatize m_b/l_b/tgt_l per TensorCore
            # and mark the i axis "parallel".
            dimension_semantics=("arbitrary", "arbitrary"),
            vmem_limit_bytes=vmem_limit),
    )(qa_n, qb_n, qa_n, qb_n)
    return {"loss": loss[0, 0], "acc": acc[0, 0]}


# ----------------------------------------------------------------------------
# Pure-JAX reference (mirrors the PyTorch module, single device)
# ----------------------------------------------------------------------------

def _reference(q_a, q_b, tau=0.1, matmul_dtype=jnp.float32):
    scale = jnp.float32(math.sqrt(1.0 / float(tau)))

    def norm(x):
        x = x.astype(jnp.float32)
        ss = jnp.sum(x * x, axis=-1, keepdims=True)
        return (x * (lax.rsqrt(jnp.maximum(ss, 1e-24)) * scale)).astype(matmul_dtype)

    qa = norm(q_a)
    qb = norm(q_b)
    B = qa.shape[0]
    labels = jnp.arange(B)
    mask = jax.nn.one_hot(labels, B, dtype=jnp.float32) * 1e9

    dot = lambda x, y: jnp.dot(x, y.T, preferred_element_type=jnp.float32)
    laa = dot(qa, qa) - mask
    lbb = dot(qb, qb) - mask
    lab = dot(qa, qb)
    lba = dot(qb, qa)

    def ce(logits):
        return jnp.mean(jax.nn.logsumexp(logits, axis=1)
                        - logits[jnp.arange(B), labels])

    loss = 0.5 * (ce(jnp.concatenate([lab, laa], axis=1))
                  + ce(jnp.concatenate([lba, lbb], axis=1)))
    pred = jnp.argmax(jnp.concatenate([lab, laa], axis=1), axis=-1)
    acc = 100.0 * jnp.sum(pred == labels) / B
    return loss, acc


if __name__ == "__main__":
    key = jax.random.PRNGKey(0)
    k1, k2, k3 = jax.random.split(key, 3)

    # Test 1: multi-tile grid (forced T=16 -> 4x4 grid). Correlated views so the
    # accuracy (100%) is insensitive to bf16 rounding; loss is checked against
    # the f32 reference with a bf16-appropriate tolerance.
    B, D = 64, 256
    q_a = jax.random.normal(k1, (B, D), dtype=jnp.float32)
    q_b = q_a + 0.05 * jax.random.normal(k2, (B, D), dtype=jnp.float32)

    out = inter_simclr_loss(q_a, q_b, temperature=0.1, tile=16)
    jax.block_until_ready(out["loss"])
    jax.block_until_ready(out["acc"])
    ref_loss, ref_acc = _reference(q_a, q_b, tau=0.1)
    assert jnp.allclose(out["loss"], ref_loss, rtol=2e-2, atol=2e-3), \
        (out["loss"], ref_loss)
    assert jnp.allclose(out["acc"], ref_acc, atol=1e-3), (out["acc"], ref_acc)

    # Test 2: single-tile path (default device-dependent tile), independent views.
    # Compare against a bf16-matched reference (same matmul precision as the
    # kernel) tightly, and the f32 reference loosely.
    B2, D2 = 16, 128
    q_a2 = jax.random.normal(k2, (B2, D2), dtype=jnp.float32)
    q_b2 = jax.random.normal(k3, (B2, D2), dtype=jnp.float32)

    out2 = inter_simclr_loss(q_a2, q_b2, temperature=0.1)
    jax.block_until_ready(out2["loss"])
    jax.block_until_ready(out2["acc"])
    ref_loss_bf, ref_acc_bf = _reference(q_a2, q_b2, tau=0.1,
                                         matmul_dtype=jnp.bfloat16)
    ref_loss_f32, _ = _reference(q_a2, q_b2, tau=0.1)
    assert jnp.allclose(out2["loss"], ref_loss_bf, rtol=1e-3, atol=1e-3), \
        (out2["loss"], ref_loss_bf)
    assert jnp.allclose(out2["acc"], ref_acc_bf, atol=1e-3), \
        (out2["acc"], ref_acc_bf)
    assert jnp.allclose(out2["loss"], ref_loss_f32, rtol=5e-2, atol=5e-2), \
        (out2["loss"], ref_loss_f32)

    print("KERNEL_OK")
</pallas_src>

<mosaic_0001>
module attributes {stable_mosaic.version = 11 : i64} {
  func.func @_simclr_kernel(%arg0: i32, %arg1: i32, %arg2: memref<16x256xbf16, #tpu.memory_space<vmem>>, %arg3: memref<16x256xbf16, #tpu.memory_space<vmem>>, %arg4: memref<16x256xbf16, #tpu.memory_space<vmem>>, %arg5: memref<16x256xbf16, #tpu.memory_space<vmem>>, %arg6: memref<1x1xf32, #tpu.memory_space<smem>>, %arg7: memref<1x1xf32, #tpu.memory_space<smem>>, %arg8: memref<16x1xf32, #tpu.memory_space<vmem>>, %arg9: memref<16x1xf32, #tpu.memory_space<vmem>>, %arg10: memref<16x1xf32, #tpu.memory_space<vmem>>, %arg11: memref<16x1xf32, #tpu.memory_space<vmem>>, %arg12: memref<16x1xi32, #tpu.memory_space<vmem>>, %arg13: memref<4x1x16xf32, #tpu.memory_space<vmem>>, %arg14: memref<4x1x16xf32, #tpu.memory_space<vmem>>, %arg15: memref<4x1x16xf32, #tpu.memory_space<vmem>>, %arg16: memref<2xf32, #tpu.memory_space<smem>>) attributes {dimension_semantics = [#tpu.dimension_semantics<arbitrary>, #tpu.dimension_semantics<arbitrary>], iteration_bounds = array<i64: 4, 4>, scalar_prefetch = 0 : i64, scratch_operands = 9 : i64, tpu.core_type = #tpu.core_type<tc>, window_params = [{transform_indices = @transform_0, window_bounds = array<i64: 16, 256>}, {transform_indices = @transform_1, window_bounds = array<i64: 16, 256>}, {transform_indices = @transform_2, window_bounds = array<i64: 16, 256>}, {transform_indices = @transform_3, window_bounds = array<i64: 16, 256>}, {transform_indices = @transform_4, window_bounds = array<i64: 1, 1>}, {transform_indices = @transform_5, window_bounds = array<i64: 1, 1>}]} {
    %c0_i32 = arith.constant 0 : i32
    %0 = arith.cmpi eq, %arg0, %c0_i32 : i32
    %c0_i32_0 = arith.constant 0 : i32
    %1 = arith.cmpi eq, %arg1, %c0_i32_0 : i32
    %2 = arith.andi %0, %1 : i1
    %3 = arith.extui %2 : i1 to i32
    %c0_i32_1 = arith.constant 0 : i32
    %4 = arith.cmpi ne, %3, %c0_i32_1 : i32
    scf.if %4 {
      %cst_51 = arith.constant -1.000000e+30 : f32
      %89 = vector.broadcast %cst_51 : f32 to vector<4x1x16xf32>
      %c0_52 = arith.constant 0 : index
      %c0_53 = arith.constant 0 : index
      %c0_54 = arith.constant 0 : index
      %90 = vector.load %arg13[%c0_52, %c0_53, %c0_54] : memref<4x1x16xf32, #tpu.memory_space<vmem>>, vector<4x1x16xf32>
      tpu.vector_store %arg13[%c0_52, %c0_53, %c0_54], %89 {strides = array<i32>} : memref<4x1x16xf32, #tpu.memory_space<vmem>>, vector<4x1x16xf32>,
      %cst_55 = arith.constant 0.000000e+00 : f32
      %91 = vector.broadcast %cst_55 : f32 to vector<4x1x16xf32>
      %c0_56 = arith.constant 0 : index
      %c0_57 = arith.constant 0 : index
      %c0_58 = arith.constant 0 : index
      %92 = vector.load %arg14[%c0_56, %c0_57, %c0_58] : memref<4x1x16xf32, #tpu.memory_space<vmem>>, vector<4x1x16xf32>
      tpu.vector_store %arg14[%c0_56, %c0_57, %c0_58], %91 {strides = array<i32>} : memref<4x1x16xf32, #tpu.memory_space<vmem>>, vector<4x1x16xf32>,
      %cst_59 = arith.constant 0.000000e+00 : f32
      %c0_60 = arith.constant 0 : index
      %93 = memref.load %arg16[%c0_60] : memref<2xf32, #tpu.memory_space<smem>>
      memref.store %cst_59, %arg16[%c0_60] : memref<2xf32, #tpu.memory_space<smem>>
      %cst_61 = arith.constant 0.000000e+00 : f32
      %c1 = arith.constant 1 : index
      %94 = memref.load %arg16[%c1] : memref<2xf32, #tpu.memory_space<smem>>
      memref.store %cst_61, %arg16[%c1] : memref<2xf32, #tpu.memory_space<smem>>
    } else {
    }
    %c0_i32_2 = arith.constant 0 : i32
    %5 = arith.cmpi eq, %arg1, %c0_i32_2 : i32
    %6 = arith.extui %5 : i1 to i32
    %c0_i32_3 = arith.constant 0 : i32
    %7 = arith.cmpi ne, %6, %c0_i32_3 : i32
    scf.if %7 {
      %cst_51 = arith.constant -1.000000e+30 : f32
      %89 = vector.broadcast %cst_51 : f32 to vector<16x1xf32>
      %c0_52 = arith.constant 0 : index
      %c0_53 = arith.constant 0 : index
      %90 = vector.load %arg8[%c0_52, %c0_53] : memref<16x1xf32, #tpu.memory_space<vmem>>, vector<16x1xf32>
      tpu.vector_store %arg8[%c0_52, %c0_53], %89 {strides = array<i32>} : memref<16x1xf32, #tpu.memory_space<vmem>>, vector<16x1xf32>,
      %cst_54 = arith.constant 0.000000e+00 : f32
      %91 = vector.broadcast %cst_54 : f32 to vector<16x1xf32>
      %c0_55 = arith.constant 0 : index
      %c0_56 = arith.constant 0 : index
      %92 = vector.load %arg9[%c0_55, %c0_56] : memref<16x1xf32, #tpu.memory_space<vmem>>, vector<16x1xf32>
      tpu.vector_store %arg9[%c0_55, %c0_56], %91 {strides = array<i32>} : memref<16x1xf32, #tpu.memory_space<vmem>>, vector<16x1xf32>,
      %cst_57 = arith.constant -1.000000e+30 : f32
      %93 = vector.broadcast %cst_57 : f32 to vector<16x1xf32>
      %c0_58 = arith.constant 0 : index
      %c0_59 = arith.constant 0 : index
      %94 = vector.load %arg11[%c0_58, %c0_59] : memref<16x1xf32, #tpu.memory_space<vmem>>, vector<16x1xf32>
      tpu.vector_store %arg11[%c0_58, %c0_59], %93 {strides = array<i32>} : memref<16x1xf32, #tpu.memory_space<vmem>>, vector<16x1xf32>,
      %c0_i32_60 = arith.constant 0 : i32
      %95 = vector.broadcast %c0_i32_60 : i32 to vector<16x1xi32>
      %c0_61 = arith.constant 0 : index
      %c0_62 = arith.constant 0 : index
      %96 = vector.load %arg12[%c0_61, %c0_62] : memref<16x1xi32, #tpu.memory_space<vmem>>, vector<16x1xi32>
      tpu.vector_store %arg12[%c0_61, %c0_62], %95 {strides = array<i32>} : memref<16x1xi32, #tpu.memory_space<vmem>>, vector<16x1xi32>,
    } else {
    }
    %c0 = arith.constant 0 : index
    %c0_4 = arith.constant 0 : index
    %8 = vector.load %arg2[%c0, %c0_4] : memref<16x256xbf16, #tpu.memory_space<vmem>>, vector<16x256xbf16>
    %c0_5 = arith.constant 0 : index
    %c0_6 = arith.constant 0 : index
    %9 = vector.load %arg3[%c0_5, %c0_6] : memref<16x256xbf16, #tpu.memory_space<vmem>>, vector<16x256xbf16>
    %c0_7 = arith.constant 0 : index
    %c0_8 = arith.constant 0 : index
    %10 = vector.load %arg4[%c0_7, %c0_8] : memref<16x256xbf16, #tpu.memory_space<vmem>>, vector<16x256xbf16>
    %c0_9 = arith.constant 0 : index
    %c0_10 = arith.constant 0 : index
    %11 = vector.load %arg5[%c0_9, %c0_10] : memref<16x256xbf16, #tpu.memory_space<vmem>>, vector<16x256xbf16>
    %cst = arith.constant dense<0.000000e+00> : vector<16x16xf32>
    %12 = tpu.matmul %8, %11, %cst {dimension_numbers = #tpu.dot_dimension_numbers<[1], [1], [0], [0], [0, 0, 1, 0], [], []>} : vector<16x256xbf16>, vector<16x256xbf16>, vector<16x16xf32> -> vector<16x16xf32>
    %cst_11 = arith.constant dense<0.000000e+00> : vector<16x16xf32>
    %13 = tpu.matmul %8, %10, %cst_11 {dimension_numbers = #tpu.dot_dimension_numbers<[1], [1], [0], [0], [0, 0, 1, 0], [], []>} : vector<16x256xbf16>, vector<16x256xbf16>, vector<16x16xf32> -> vector<16x16xf32>
    %cst_12 = arith.constant dense<0.000000e+00> : vector<16x16xf32>
    %14 = tpu.matmul %9, %11, %cst_12 {dimension_numbers = #tpu.dot_dimension_numbers<[1], [1], [0], [0], [0, 0, 1, 0], [], []>} : vector<16x256xbf16>, vector<16x256xbf16>, vector<16x16xf32> -> vector<16x16xf32>
    %15 = tpu.iota {dimensions = array<i32: 1>} : vector<16x16xi32>
    %cst_13 = arith.constant dense<0xFF800000> : vector<16xf32>
    %16 = vector.multi_reduction <maximumf>, %12, %cst_13 [1] : vector<16x16xf32> to vector<16xf32>
    %17 = vector.shape_cast %16 : vector<16xf32> to vector<16x1xf32>
    %c0_14 = arith.constant 0 : index
    %c0_15 = arith.constant 0 : index
    %18 = vector.load %arg8[%c0_14, %c0_15] : memref<16x1xf32, #tpu.memory_space<vmem>>, vector<16x1xf32>
    %19 = arith.maximumf %18, %17 : vector<16x1xf32>
    %c0_16 = arith.constant 0 : index
    %c0_17 = arith.constant 0 : index
    %20 = vector.load %arg9[%c0_16, %c0_17] : memref<16x1xf32, #tpu.memory_space<vmem>>, vector<16x1xf32>
    %21 = arith.subf %18, %19 : vector<16x1xf32>
    %22 = math.exp %21 : vector<16x1xf32>
    %23 = arith.mulf %20, %22 : vector<16x1xf32>
    %24 = vector.broadcast %19 : vector<16x1xf32> to vector<16x16xf32>
    %25 = arith.subf %12, %24 : vector<16x16xf32>
    %26 = math.exp %25 : vector<16x16xf32>
    %cst_18 = arith.constant dense<0.000000e+00> : vector<16xf32>
    %27 = vector.multi_reduction <add>, %26, %cst_18 [1] : vector<16x16xf32> to vector<16xf32>
    %28 = vector.shape_cast %27 : vector<16xf32> to vector<16x1xf32>
    %29 = arith.addf %23, %28 : vector<16x1xf32>
    %c0_19 = arith.constant 0 : index
    %c0_20 = arith.constant 0 : index
    %30 = vector.load %arg9[%c0_19, %c0_20] : memref<16x1xf32, #tpu.memory_space<vmem>>, vector<16x1xf32>
    tpu.vector_store %arg9[%c0_19, %c0_20], %29 {strides = array<i32>} : memref<16x1xf32, #tpu.memory_space<vmem>>, vector<16x1xf32>,
    %c0_21 = arith.constant 0 : index
    %c0_22 = arith.constant 0 : index
    %31 = vector.load %arg8[%c0_21, %c0_22] : memref<16x1xf32, #tpu.memory_space<vmem>>, vector<16x1xf32>
    tpu.vector_store %arg8[%c0_21, %c0_22], %19 {strides = array<i32>} : memref<16x1xf32, #tpu.memory_space<vmem>>, vector<16x1xf32>,
    %cst_23 = arith.constant dense<0xFF800000> : vector<16xf32>
    %32 = vector.multi_reduction <maximumf>, %12, %cst_23 [0] : vector<16x16xf32> to vector<16xf32>
    %33 = vector.shape_cast %32 : vector<16xf32> to vector<1x16xf32>
    %34 = arith.index_cast %arg1 : i32 to index
    %c0_24 = arith.constant 0 : index
    %c0_25 = arith.constant 0 : index
    %35 = vector.load %arg13[%34, %c0_24, %c0_25] : memref<4x1x16xf32, #tpu.memory_space<vmem>>, vector<1x1x16xf32>
    %36 = vector.shape_cast %35 : vector<1x1x16xf32> to vector<1x16xf32>
    %37 = arith.maximumf %36, %33 : vector<1x16xf32>
    %38 = arith.index_cast %arg1 : i32 to index
    %c0_26 = arith.constant 0 : index
    %c0_27 = arith.constant 0 : index
    %39 = vector.load %arg14[%38, %c0_26, %c0_27] : memref<4x1x16xf32, #tpu.memory_space<vmem>>, vector<1x1x16xf32>
    %40 = vector.shape_cast %39 : vector<1x1x16xf32> to vector<1x16xf32>
    %41 = arith.subf %36, %37 : vector<1x16xf32>
    %42 = math.exp %41 : vector<1x16xf32>
    %43 = arith.mulf %40, %42 : vector<1x16xf32>
    %44 = vector.broadcast %37 : vector<1x16xf32> to vector<16x16xf32>
    %45 = arith.subf %12, %44 : vector<16x16xf32>
    %46 = math.exp %45 : vector<16x16xf32>
    %cst_28 = arith.constant dense<0.000000e+00> : vector<16xf32>
    %47 = vector.multi_reduction <add>, %46, %cst_28 [0] : vector<16x16xf32> to vector<16xf32>
    %48 = vector.shape_cast %47 : vector<16xf32> to vector<1x16xf32>
    %49 = arith.addf %43, %48 : vector<1x16xf32>
    %50 = arith.index_cast %arg1 : i32 to index
    %c0_29 = arith.constant 0 : index
    %c0_30 = arith.constant 0 : index
    %51 = vector.load %arg14[%50, %c0_29, %c0_30] : memref<4x1x16xf32, #tpu.memory_space<vmem>>, vector<1x1x16xf32>
    %52 = vector.shape_cast %51 : vector<1x1x16xf32> to vector<1x16xf32>
    %53 = vector.shape_cast %49 : vector<1x16xf32> to vector<1x1x16xf32>
    tpu.vector_store %arg14[%50, %c0_29, %c0_30], %53 {strides = array<i32>} : memref<4x1x16xf32, #tpu.memory_space<vmem>>, vector<1x1x16xf32>,
    %54 = arith.index_cast %arg1 : i32 to index
    %c0_31 = arith.constant 0 : index
    %c0_32 = arith.constant 0 : index
    %55 = vector.load %arg13[%54, %c0_31, %c0_32] : memref<4x1x16xf32, #tpu.memory_space<vmem>>, vector<1x1x16xf32>
    %56 = vector.shape_cast %55 : vector<1x1x16xf32> to vector<1x16xf32>
    %57 = vector.shape_cast %37 : vector<1x16xf32> to vector<1x1x16xf32>
    tpu.vector_store %arg13[%54, %c0_31, %c0_32], %57 {strides = array<i32>} : memref<4x1x16xf32, #tpu.memory_space<vmem>>, vector<1x1x16xf32>,
    %58 = vector.broadcast %17 : vector<16x1xf32> to vector<16x16xf32>
    %59 = arith.cmpf oeq, %12, %58 : vector<16x16xf32>
    %c16_i32 = arith.constant 16 : i32
    %60 = vector.broadcast %c16_i32 : i32 to vector<16x16xi32>
    %61 = arith.select %59, %15, %60 : vector<16x16xi1>, vector<16x16xi32>
    %cst_33 = arith.constant dense<2147483647> : vector<16xi32>
    %62 = vector.multi_reduction <minsi>, %61, %cst_33 [1] : vector<16x16xi32> to vector<16xi32>
    %63 = vector.shape_cast %62 : vector<16xi32> to vector<16x1xi32>
    %c16_i32_34 = arith.constant 16 : i32
    %64 = arith.muli %arg1, %c16_i32_34 : i32
    %65 = vector.broadcast %64 : i32 to vector<16x1xi32>
    %66 = arith.addi %63, %65 : vector<16x1xi32>
    %c0_35 = arith.constant 0 : index
    %c0_36 = arith.constant 0 : index
    %67 = vector.load %arg11[%c0_35, %c0_36] : memref<16x1xf32, #tpu.memory_space<vmem>>, vector<16x1xf32>
    %68 = arith.cmpf ogt, %17, %67 : vector<16x1xf32>
    %c0_37 = arith.constant 0 : index
    %c0_38 = arith.constant 0 : index
    %69 = vector.load %arg12[%c0_37, %c0_38] : memref<16x1xi32, #tpu.memory_space<vmem>>, vector<16x1xi32>
    %70 = arith.select %68, %66, %69 : vector<16x1xi1>, vector<16x1xi32>
    %c0_39 = arith.constant 0 : index
    %c0_40 = arith.constant 0 : index
    %71 = vector.load %arg12[%c0_39, %c0_40] : memref<16x1xi32, #tpu.memory_space<vmem>>, vector<16x1xi32>
    tpu.vector_store %arg12[%c0_39, %c0_40], %70 {strides = array<i32>} : memref<16x1xi32, #tpu.memory_space<vmem>>, vector<16x1xi32>,
    %c0_41 = arith.constant 0 : index
    %c0_42 = arith.constant 0 : index
    %72 = vector.load %arg11[%c0_41, %c0_42] : memref<16x1xf32, #tpu.memory_space<vmem>>, vector<16x1xf32>
    %73 = arith.select %68, %17, %72 : vector<16x1xi1>, vector<16x1xf32>
    %c0_43 = arith.constant 0 : index
    %c0_44 = arith.constant 0 : index
    %74 = vector.load %arg11[%c0_43, %c0_44] : memref<16x1xf32, #tpu.memory_space<vmem>>, vector<16x1xf32>
    tpu.vector_store %arg11[%c0_43, %c0_44], %73 {strides = array<i32>} : memref<16x1xf32, #tpu.memory_space<vmem>>, vector<16x1xf32>,
    %75 = arith.cmpi ne, %arg0, %arg1 : i32
    %76 = arith.extui %75 : i1 to i32
    %c0_i32_45 = arith.constant 0 : i32
    %77 = arith.cmpi ne, %76, %c0_i32_45 : i32
    scf.if %77 {
      %cst_51 = arith.constant dense<0xFF800000> : vector<16xf32>
      %89 = vector.multi_reduction <maximumf>, %13, %cst_51 [1] : vector<16x16xf32> to vector<16xf32>
      %90 = vector.shape_cast %89 : vector<16xf32> to vector<16x1xf32>
      %c0_52 = arith.constant 0 : index
      %c0_53 = arith.constant 0 : index
      %91 = vector.load %arg8[%c0_52, %c0_53] : memref<16x1xf32, #tpu.memory_space<vmem>>, vector<16x1xf32>
      %92 = arith.maximumf %91, %90 : vector<16x1xf32>
      %c0_54 = arith.constant 0 : index
      %c0_55 = arith.constant 0 : index
      %93 = vector.load %arg9[%c0_54, %c0_55] : memref<16x1xf32, #tpu.memory_space<vmem>>, vector<16x1xf32>
      %94 = arith.subf %91, %92 : vector<16x1xf32>
      %95 = math.exp %94 : vector<16x1xf32>
      %96 = arith.mulf %93, %95 : vector<16x1xf32>
      %97 = vector.broadcast %92 : vector<16x1xf32> to vector<16x16xf32>
      %98 = arith.subf %13, %97 : vector<16x16xf32>
      %99 = math.exp %98 : vector<16x16xf32>
      %cst_56 = arith.constant dense<0.000000e+00> : vector<16xf32>
      %100 = vector.multi_reduction <add>, %99, %cst_56 [1] : vector<16x16xf32> to vector<16xf32>
      %101 = vector.shape_cast %100 : vector<16xf32> to vector<16x1xf32>
      %102 = arith.addf %96, %101 : vector<16x1xf32>
      %c0_57 = arith.constant 0 : index
      %c0_58 = arith.constant 0 : index
      %103 = vector.load %arg9[%c0_57, %c0_58] : memref<16x1xf32, #tpu.memory_space<vmem>>, vector<16x1xf32>
      tpu.vector_store %arg9[%c0_57, %c0_58], %102 {strides = array<i32>} : memref<16x1xf32, #tpu.memory_space<vmem>>, vector<16x1xf32>,
      %c0_59 = arith.constant 0 : index
      %c0_60 = arith.constant 0 : index
      %104 = vector.load %arg8[%c0_59, %c0_60] : memref<16x1xf32, #tpu.memory_space<vmem>>, vector<16x1xf32>
      tpu.vector_store %arg8[%c0_59, %c0_60], %92 {strides = array<i32>} : memref<16x1xf32, #tpu.memory_space<vmem>>, vector<16x1xf32>,
      %cst_61 = arith.constant dense<0xFF800000> : vector<16xf32>
      %105 = vector.multi_reduction <maximumf>, %14, %cst_61 [0] : vector<16x16xf32> to vector<16xf32>
      %106 = vector.shape_cast %105 : vector<16xf32> to vector<1x16xf32>
      %107 = arith.index_cast %arg1 : i32 to index
      %c0_62 = arith.constant 0 : index
      %c0_63 = arith.constant 0 : index
      %108 = vector.load %arg13[%107, %c0_62, %c0_63] : memref<4x1x16xf32, #tpu.memory_space<vmem>>, vector<1x1x16xf32>
      %109 = vector.shape_cast %108 : vector<1x1x16xf32> to vector<1x16xf32>
      %110 = arith.maximumf %109, %106 : vector<1x16xf32>
      %111 = arith.index_cast %arg1 : i32 to index
      %c0_64 = arith.constant 0 : index
      %c0_65 = arith.constant 0 : index
      %112 = vector.load %arg14[%111, %c0_64, %c0_65] : memref<4x1x16xf32, #tpu.memory_space<vmem>>, vector<1x1x16xf32>
      %113 = vector.shape_cast %112 : vector<1x1x16xf32> to vector<1x16xf32>
      %114 = arith.subf %109, %110 : vector<1x16xf32>
      %115 = math.exp %114 : vector<1x16xf32>
      %116 = arith.mulf %113, %115 : vector<1x16xf32>
      %117 = vector.broadcast %110 : vector<1x16xf32> to vector<16x16xf32>
      %118 = arith.subf %14, %117 : vector<16x16xf32>
      %119 = math.exp %118 : vector<16x16xf32>
      %cst_66 = arith.constant dense<0.000000e+00> : vector<16xf32>
      %120 = vector.multi_reduction <add>, %119, %cst_66 [0] : vector<16x16xf32> to vector<16xf32>
      %121 = vector.shape_cast %120 : vector<16xf32> to vector<1x16xf32>
      %122 = arith.addf %116, %121 : vector<1x16xf32>
      %123 = arith.index_cast %arg1 : i32 to index
      %c0_67 = arith.constant 0 : index
      %c0_68 = arith.constant 0 : index
      %124 = vector.load %arg14[%123, %c0_67, %c0_68] : memref<4x1x16xf32, #tpu.memory_space<vmem>>, vector<1x1x16xf32>
      %125 = vector.shape_cast %124 : vector<1x1x16xf32> to vector<1x16xf32>
      %126 = vector.shape_cast %122 : vector<1x16xf32> to vector<1x1x16xf32>
      tpu.vector_store %arg14[%123, %c0_67, %c0_68], %126 {strides = array<i32>} : memref<4x1x16xf32, #tpu.memory_space<vmem>>, vector<1x1x16xf32>,
      %127 = arith.index_cast %arg1 : i32 to index
      %c0_69 = arith.constant 0 : index
      %c0_70 = arith.constant 0 : index
      %128 = vector.load %arg13[%127, %c0_69, %c0_70] : memref<4x1x16xf32, #tpu.memory_space<vmem>>, vector<1x1x16xf32>
      %129 = vector.shape_cast %128 : vector<1x1x16xf32> to vector<1x16xf32>
      %130 = vector.shape_cast %110 : vector<1x16xf32> to vector<1x1x16xf32>
      tpu.vector_store %arg13[%127, %c0_69, %c0_70], %130 {strides = array<i32>} : memref<4x1x16xf32, #tpu.memory_space<vmem>>, vector<1x1x16xf32>,
    } else {
    }
    %78 = arith.cmpi eq, %arg0, %arg1 : i32
    %79 = arith.extui %78 : i1 to i32
    %c0_i32_46 = arith.constant 0 : i32
    %80 = arith.cmpi ne, %79, %c0_i32_46 : i32
    scf.if %80 {
      %89 = tpu.iota {dimensions = array<i32: 0>} : vector<16x16xi32>
      %90 = arith.cmpi eq, %15, %89 : vector<16x16xi32>
      %cst_51 = arith.constant 1.000000e+09 : f32
      %cst_52 = arith.constant 0.000000e+00 : f32
      %91 = vector.broadcast %cst_51 : f32 to vector<16x16xf32>
      %92 = vector.broadcast %cst_52 : f32 to vector<16x16xf32>
      %93 = arith.select %90, %91, %92 : vector<16x16xi1>, vector<16x16xf32>
      %94 = arith.subf %13, %93 : vector<16x16xf32>
      %95 = arith.subf %14, %93 : vector<16x16xf32>
      %cst_53 = arith.constant dense<0xFF800000> : vector<16xf32>
      %96 = vector.multi_reduction <maximumf>, %94, %cst_53 [1] : vector<16x16xf32> to vector<16xf32>
      %97 = vector.shape_cast %96 : vector<16xf32> to vector<16x1xf32>
      %c0_54 = arith.constant 0 : index
      %c0_55 = arith.constant 0 : index
      %98 = vector.load %arg8[%c0_54, %c0_55] : memref<16x1xf32, #tpu.memory_space<vmem>>, vector<16x1xf32>
      %99 = arith.maximumf %98, %97 : vector<16x1xf32>
      %c0_56 = arith.constant 0 : index
      %c0_57 = arith.constant 0 : index
      %100 = vector.load %arg9[%c0_56, %c0_57] : memref<16x1xf32, #tpu.memory_space<vmem>>, vector<16x1xf32>
      %101 = arith.subf %98, %99 : vector<16x1xf32>
      %102 = math.exp %101 : vector<16x1xf32>
      %103 = arith.mulf %100, %102 : vector<16x1xf32>
      %104 = vector.broadcast %99 : vector<16x1xf32> to vector<16x16xf32>
      %105 = arith.subf %94, %104 : vector<16x16xf32>
      %106 = math.exp %105 : vector<16x16xf32>
      %cst_58 = arith.constant dense<0.000000e+00> : vector<16xf32>
      %107 = vector.multi_reduction <add>, %106, %cst_58 [1] : vector<16x16xf32> to vector<16xf32>
      %108 = vector.shape_cast %107 : vector<16xf32> to vector<16x1xf32>
      %109 = arith.addf %103, %108 : vector<16x1xf32>
      %c0_59 = arith.constant 0 : index
      %c0_60 = arith.constant 0 : index
      %110 = vector.load %arg9[%c0_59, %c0_60] : memref<16x1xf32, #tpu.memory_space<vmem>>, vector<16x1xf32>
      tpu.vector_store %arg9[%c0_59, %c0_60], %109 {strides = array<i32>} : memref<16x1xf32, #tpu.memory_space<vmem>>, vector<16x1xf32>,
      %c0_61 = arith.constant 0 : index
      %c0_62 = arith.constant 0 : index
      %111 = vector.load %arg8[%c0_61, %c0_62] : memref<16x1xf32, #tpu.memory_space<vmem>>, vector<16x1xf32>
      tpu.vector_store %arg8[%c0_61, %c0_62], %99 {strides = array<i32>} : memref<16x1xf32, #tpu.memory_space<vmem>>, vector<16x1xf32>,
      %cst_63 = arith.constant dense<0xFF800000> : vector<16xf32>
      %112 = vector.multi_reduction <maximumf>, %95, %cst_63 [0] : vector<16x16xf32> to vector<16xf32>
      %113 = vector.shape_cast %112 : vector<16xf32> to vector<1x16xf32>
      %114 = arith.index_cast %arg1 : i32 to index
      %c0_64 = arith.constant 0 : index
      %c0_65 = arith.constant 0 : index
      %115 = vector.load %arg13[%114, %c0_64, %c0_65] : memref<4x1x16xf32, #tpu.memory_space<vmem>>, vector<1x1x16xf32>
      %116 = vector.shape_cast %115 : vector<1x1x16xf32> to vector<1x16xf32>
      %117 = arith.maximumf %116, %113 : vector<1x16xf32>
      %118 = arith.index_cast %arg1 : i32 to index
      %c0_66 = arith.constant 0 : index
      %c0_67 = arith.constant 0 : index
      %119 = vector.load %arg14[%118, %c0_66, %c0_67] : memref<4x1x16xf32, #tpu.memory_space<vmem>>, vector<1x1x16xf32>
      %120 = vector.shape_cast %119 : vector<1x1x16xf32> to vector<1x16xf32>
      %121 = arith.subf %116, %117 : vector<1x16xf32>
      %122 = math.exp %121 : vector<1x16xf32>
      %123 = arith.mulf %120, %122 : vector<1x16xf32>
      %124 = vector.broadcast %117 : vector<1x16xf32> to vector<16x16xf32>
      %125 = arith.subf %95, %124 : vector<16x16xf32>
      %126 = math.exp %125 : vector<16x16xf32>
      %cst_68 = arith.constant dense<0.000000e+00> : vector<16xf32>
      %127 = vector.multi_reduction <add>, %126, %cst_68 [0] : vector<16x16xf32> to vector<16xf32>
      %128 = vector.shape_cast %127 : vector<16xf32> to vector<1x16xf32>
      %129 = arith.addf %123, %128 : vector<1x16xf32>
      %130 = arith.index_cast %arg1 : i32 to index
      %c0_69 = arith.constant 0 : index
      %c0_70 = arith.constant 0 : index
      %131 = vector.load %arg14[%130, %c0_69, %c0_70] : memref<4x1x16xf32, #tpu.memory_space<vmem>>, vector<1x1x16xf32>
      %132 = vector.shape_cast %131 : vector<1x1x16xf32> to vector<1x16xf32>
      %133 = vector.shape_cast %129 : vector<1x16xf32> to vector<1x1x16xf32>
      tpu.vector_store %arg14[%130, %c0_69, %c0_70], %133 {strides = array<i32>} : memref<4x1x16xf32, #tpu.memory_space<vmem>>, vector<1x1x16xf32>,
      %134 = arith.index_cast %arg1 : i32 to index
      %c0_71 = arith.constant 0 : index
      %c0_72 = arith.constant 0 : index
      %135 = vector.load %arg13[%134, %c0_71, %c0_72] : memref<4x1x16xf32, #tpu.memory_space<vmem>>, vector<1x1x16xf32>
      %136 = vector.shape_cast %135 : vector<1x1x16xf32> to vector<1x16xf32>
      %137 = vector.shape_cast %117 : vector<1x16xf32> to vector<1x1x16xf32>
      tpu.vector_store %arg13[%134, %c0_71, %c0_72], %137 {strides = array<i32>} : memref<4x1x16xf32, #tpu.memory_space<vmem>>, vector<1x1x16xf32>,
      %cst_73 = arith.constant 0.000000e+00 : f32
      %138 = vector.broadcast %cst_73 : f32 to vector<16x16xf32>
      %139 = arith.select %90, %12, %138 : vector<16x16xi1>, vector<16x16xf32>
      %cst_74 = arith.constant dense<0.000000e+00> : vector<16xf32>
      %140 = vector.multi_reduction <add>, %139, %cst_74 [1] : vector<16x16xf32> to vector<16xf32>
      %141 = vector.shape_cast %140 : vector<16xf32> to vector<16x1xf32>
      %c0_75 = arith.constant 0 : index
      %c0_76 = arith.constant 0 : index
      %142 = vector.load %arg10[%c0_75, %c0_76] : memref<16x1xf32, #tpu.memory_space<vmem>>, vector<16x1xf32>
      tpu.vector_store %arg10[%c0_75, %c0_76], %141 {strides = array<i32>} : memref<16x1xf32, #tpu.memory_space<vmem>>, vector<16x1xf32>,
      %cst_77 = arith.constant dense<0.000000e+00> : vector<16xf32>
      %143 = vector.multi_reduction <add>, %139, %cst_77 [0] : vector<16x16xf32> to vector<16xf32>
      %144 = vector.shape_cast %143 : vector<16xf32> to vector<1x16xf32>
      %145 = arith.index_cast %arg1 : i32 to index
      %c0_78 = arith.constant 0 : index
      %c0_79 = arith.constant 0 : index
      %146 = vector.load %arg15[%145, %c0_78, %c0_79] : memref<4x1x16xf32, #tpu.memory_space<vmem>>, vector<1x1x16xf32>
      %147 = vector.shape_cast %146 : vector<1x1x16xf32> to vector<1x16xf32>
      %148 = vector.shape_cast %144 : vector<1x16xf32> to vector<1x1x16xf32>
      tpu.vector_store %arg15[%145, %c0_78, %c0_79], %148 {strides = array<i32>} : memref<4x1x16xf32, #tpu.memory_space<vmem>>, vector<1x1x16xf32>,
    } else {
    }
    %c3_i32 = arith.constant 3 : i32
    %81 = arith.cmpi eq, %arg1, %c3_i32 : i32
    %82 = arith.extui %81 : i1 to i32
    %c0_i32_47 = arith.constant 0 : i32
    %83 = arith.cmpi ne, %82, %c0_i32_47 : i32
    scf.if %83 {
      %c0_51 = arith.constant 0 : index
      %c0_52 = arith.constant 0 : index
      %89 = vector.load %arg8[%c0_51, %c0_52] : memref<16x1xf32, #tpu.memory_space<vmem>>, vector<16x1xf32>
      %c0_53 = arith.constant 0 : index
      %c0_54 = arith.constant 0 : index
      %90 = vector.load %arg9[%c0_53, %c0_54] : memref<16x1xf32, #tpu.memory_space<vmem>>, vector<16x1xf32>
      %91 = math.log %90 : vector<16x1xf32>
      %92 = arith.addf %89, %91 : vector<16x1xf32>
      %c0_55 = arith.constant 0 : index
      %93 = memref.load %arg16[%c0_55] : memref<2xf32, #tpu.memory_space<smem>>
      %c0_56 = arith.constant 0 : index
      %c0_57 = arith.constant 0 : index
      %94 = vector.load %arg10[%c0_56, %c0_57] : memref<16x1xf32, #tpu.memory_space<vmem>>, vector<16x1xf32>
      %95 = arith.subf %92, %94 : vector<16x1xf32>
      %96 = vector.shape_cast %95 : vector<16x1xf32> to vector<1x16x1xf32>
      %cst_58 = arith.constant dense<0.000000e+00> : vector<1xf32>
      %97 = vector.multi_reduction <add>, %96, %cst_58 [1, 2] : vector<1x16x1xf32> to vector<1xf32>
      %98 = vector.shape_cast %97 : vector<1xf32> to vector<1x1x1xf32>
      %99 = vector.extract %98[0, 0, 0] : f32 from vector<1x1x1xf32>
      %100 = arith.addf %93, %99 : f32
      %c0_59 = arith.constant 0 : index
      %101 = memref.load %arg16[%c0_59] : memref<2xf32, #tpu.memory_space<smem>>
      memref.store %100, %arg16[%c0_59] : memref<2xf32, #tpu.memory_space<smem>>
      %c16_i32_60 = arith.constant 16 : i32
      %102 = arith.muli %arg0, %c16_i32_60 : i32
      %103 = tpu.iota {dimensions = array<i32: 0>} : vector<16x1xi32>
      %104 = vector.broadcast %102 : i32 to vector<16x1xi32>
      %105 = arith.addi %104, %103 : vector<16x1xi32>
      %c0_61 = arith.constant 0 : index
      %c0_62 = arith.constant 0 : index
      %106 = vector.load %arg11[%c0_61, %c0_62] : memref<16x1xf32, #tpu.memory_space<vmem>>, vector<16x1xf32>
      %c0_63 = arith.constant 0 : index
      %c0_64 = arith.constant 0 : index
      %107 = vector.load %arg8[%c0_63, %c0_64] : memref<16x1xf32, #tpu.memory_space<vmem>>, vector<16x1xf32>
      %108 = arith.cmpf oeq, %106, %107 : vector<16x1xf32>
      %c0_65 = arith.constant 0 : index
      %c0_66 = arith.constant 0 : index
      %109 = vector.load %arg12[%c0_65, %c0_66] : memref<16x1xi32, #tpu.memory_space<vmem>>, vector<16x1xi32>
      %110 = arith.cmpi eq, %109, %105 : vector<16x1xi32>
      %111 = arith.andi %108, %110 : vector<16x1xi1>
      %c1 = arith.constant 1 : index
      %112 = memref.load %arg16[%c1] : memref<2xf32, #tpu.memory_space<smem>>
      %113 = arith.extui %111 : vector<16x1xi1> to vector<16x1xi32>
      %114 = arith.sitofp %113 : vector<16x1xi32> to vector<16x1xf32>
      %115 = vector.shape_cast %114 : vector<16x1xf32> to vector<1x16x1xf32>
      %cst_67 = arith.constant dense<0.000000e+00> : vector<1xf32>
      %116 = vector.multi_reduction <add>, %115, %cst_67 [1, 2] : vector<1x16x1xf32> to vector<1xf32>
      %117 = vector.shape_cast %116 : vector<1xf32> to vector<1x1x1xf32>
      %118 = vector.extract %117[0, 0, 0] : f32 from vector<1x1x1xf32>
      %119 = arith.addf %112, %118 : f32
      %c1_68 = arith.constant 1 : index
      %120 = memref.load %arg16[%c1_68] : memref<2xf32, #tpu.memory_space<smem>>
      memref.store %119, %arg16[%c1_68] : memref<2xf32, #tpu.memory_space<smem>>
    } else {
    }
    %c3_i32_48 = arith.constant 3 : i32
    %84 = arith.cmpi eq, %arg0, %c3_i32_48 : i32
    %c3_i32_49 = arith.constant 3 : i32
    %85 = arith.cmpi eq, %arg1, %c3_i32_49 : i32
    %86 = arith.andi %84, %85 : i1
    %87 = arith.extui %86 : i1 to i32
    %c0_i32_50 = arith.constant 0 : i32
    %88 = arith.cmpi ne, %87, %c0_i32_50 : i32
    scf.if %88 {
      %c0_51 = arith.constant 0 : index
      %c0_52 = arith.constant 0 : index
      %c0_53 = arith.constant 0 : index
      %89 = vector.load %arg13[%c0_51, %c0_52, %c0_53] : memref<4x1x16xf32, #tpu.memory_space<vmem>>, vector<4x1x16xf32>
      %c0_54 = arith.constant 0 : index
      %c0_55 = arith.constant 0 : index
      %c0_56 = arith.constant 0 : index
      %90 = vector.load %arg14[%c0_54, %c0_55, %c0_56] : memref<4x1x16xf32, #tpu.memory_space<vmem>>, vector<4x1x16xf32>
      %91 = math.log %90 : vector<4x1x16xf32>
      %92 = arith.addf %89, %91 : vector<4x1x16xf32>
      %c0_57 = arith.constant 0 : index
      %c0_58 = arith.constant 0 : index
      %c0_59 = arith.constant 0 : index
      %93 = vector.load %arg15[%c0_57, %c0_58, %c0_59] : memref<4x1x16xf32, #tpu.memory_space<vmem>>, vector<4x1x16xf32>
      %94 = arith.subf %92, %93 : vector<4x1x16xf32>
      %95 = vector.shape_cast %94 : vector<4x1x16xf32> to vector<1x4x1x16xf32>
      %cst_60 = arith.constant dense<0.000000e+00> : vector<1xf32>
      %96 = vector.multi_reduction <add>, %95, %cst_60 [1, 2, 3] : vector<1x4x1x16xf32> to vector<1xf32>
      %97 = vector.shape_cast %96 : vector<1xf32> to vector<1x1x1x1xf32>
      %98 = vector.extract %97[0, 0, 0, 0] : f32 from vector<1x1x1x1xf32>
      %cst_61 = arith.constant 1.000000e+00 : f32
      %cst_62 = arith.constant 6.400000e+01 : f32
      %99 = arith.divf %cst_61, %cst_62 : f32
      %c0_63 = arith.constant 0 : index
      %100 = memref.load %arg16[%c0_63] : memref<2xf32, #tpu.memory_space<smem>>
      %101 = arith.addf %100, %98 : f32
      %cst_64 = arith.constant 5.000000e-01 : f32
      %102 = arith.mulf %cst_64, %101 : f32
      %103 = arith.mulf %102, %99 : f32
      %c0_65 = arith.constant 0 : index
      %c0_66 = arith.constant 0 : index
      %104 = memref.load %arg6[%c0_65, %c0_66] : memref<1x1xf32, #tpu.memory_space<smem>>
      memref.store %103, %arg6[%c0_65, %c0_66] : memref<1x1xf32, #tpu.memory_space<smem>>
      %c1 = arith.constant 1 : index
      %105 = memref.load %arg16[%c1] : memref<2xf32, #tpu.memory_space<smem>>
      %cst_67 = arith.constant 1.000000e+02 : f32
      %106 = arith.mulf %cst_67, %105 : f32
      %107 = arith.mulf %106, %99 : f32
      %c0_68 = arith.constant 0 : index
      %c0_69 = arith.constant 0 : index
      %108 = memref.load %arg7[%c0_68, %c0_69] : memref<1x1xf32, #tpu.memory_space<smem>>
      memref.store %107, %arg7[%c0_68, %c0_69] : memref<1x1xf32, #tpu.memory_space<smem>>
    } else {
    }
    return
  }
  func.func @transform_0(%arg0: i32, %arg1: i32) -> (i32, i32) {
    %c0_i32 = arith.constant 0 : i32
    %c0_i32_0 = arith.constant 0 : i32
    return %arg0, %c0_i32 : i32, i32
  }
  func.func @transform_1(%arg0: i32, %arg1: i32) -> (i32, i32) {
    %c0_i32 = arith.constant 0 : i32
    %c0_i32_0 = arith.constant 0 : i32
    return %arg0, %c0_i32 : i32, i32
  }
  func.func @transform_2(%arg0: i32, %arg1: i32) -> (i32, i32) {
    %c0_i32 = arith.constant 0 : i32
    %c0_i32_0 = arith.constant 0 : i32
    return %arg1, %c0_i32 : i32, i32
  }
  func.func @transform_3(%arg0: i32, %arg1: i32) -> (i32, i32) {
    %c0_i32 = arith.constant 0 : i32
    %c0_i32_0 = arith.constant 0 : i32
    return %arg1, %c0_i32 : i32, i32
  }
  func.func @transform_4(%arg0: i32, %arg1: i32) -> (i32, i32) {
    %c0_i32 = arith.constant 0 : i32
    %c0_i32_0 = arith.constant 0 : i32
    %c0_i32_1 = arith.constant 0 : i32
    return %c0_i32, %c0_i32_0 : i32, i32
  }
  func.func @transform_5(%arg0: i32, %arg1: i32) -> (i32, i32) {
    %c0_i32 = arith.constant 0 : i32
    %c0_i32_0 = arith.constant 0 : i32
    %c0_i32_1 = arith.constant 0 : i32
    return %c0_i32, %c0_i32_0 : i32, i32
  }
}

</mosaic_0001>

<bundles_post_ra>
// kernel: tpu_custom_call.1
= control target key start
LH: loop header
LB: loop body
LE: loop exit
PB: predicated region body
PF: predicated region fallthrough
CT: control target
= control target key end

     0   :  { %s2243_s0 = inlined_call_operand.hbm [shape: bf16[64,256], index: 0, kind: input, shape index: {}]   ;;  %s2244_s1 = inlined_call_operand.hbm [shape: bf16[64,256], index: 1, kind: input, shape index: {}]   ;;  %s2245_s2 = inlined_call_operand.hbm [shape: bf16[64,256], index: 2, kind: input, shape index: {}]   ;;  %s2246_s3 = inlined_call_operand.hbm [shape: bf16[64,256], index: 3, kind: input, shape index: {}]   ;;  %s2247_s4 = inlined_call_operand.hbm [shape: f32[1,1], index: 4, kind: output, shape index: {0}]   ;;  %s2248_s5 = inlined_call_operand.hbm [shape: f32[1,1], index: 5, kind: output, shape index: {1}]  }
   0x1   :  { %2258 = sst [smem:[#allocation33_spill]] %s2243_s0 }
   0x2   :  { %2259 = sst [smem:[#allocation34_spill]] %s2244_s1 }
   0x3   :  { %2260 = sst [smem:[#allocation35_spill]] %s2247_s4 }
   0x4   :  { %2261 = sst [smem:[#allocation36_spill]] %s2248_s5 }
   0x5   :  { %11 = vsyncpa [#allocation12], 0 }
   0x6   :  { %13 = vsyncpa [#allocation12 + $0x1], 0 }
   0x7   :  { %14 = vsyncpa [#allocation15], 0 }
   0x8   :  { %16 = vsyncpa [#allocation15 + $0x1], 0 }
   0x9   :  { %17 = vsyncpa [#allocation18], 0 }
   0xa   :  { %19 = vsyncpa [#allocation18 + $0x1], 0 }
   0xb   :  { %20 = vsyncpa [#allocation13], 0 }
   0xc   :  { %21 = vsyncpa [#allocation21], 0  ;;  %s1781_s18 = smov 0   ;;  %s1783_s19 = smov 0  }
   0xd   :  { %s1785_s20 = smov 0   ;;  %s1787_s21 = smov 0  }
   0xe   :  { %s1789_s22 = smov 0   ;;  %s1791_s23 = smov 0  }
   0xf   :  { %s1793_s24 = smov 0   ;;  %s1795_s25 = smov 0  }
  0x10   :  { %s1797_s26 = smov 0   ;;  %s1799_s27 = smov 0  }
  0x11   :  { %s1801_s28 = smov 0  }
  0x12 LB: > { %2262 = sst [smem:[#allocation28_spill]] %s1718_s24  ;;  %s1835_s29 = sadd.s32 4294967295, %s1734_s28   ;;  %s1734_s28 = sphi %s1801_s28, %s27_s28   ;;  %s1730_s27 = sphi %s1799_s27, %s2290_s27   ;;  %s1726_s26 = sphi %s1797_s26, %s2298_s26   ;;  %s1722_s25 = sphi %s1795_s25, %s2288_s25   ;;  %s1718_s24 = sphi %s1793_s24, %s2297_s24   ;;  %s1714_s23 = sphi %s1791_s23, %s2296_s23   ;;  %s1710_s22 = sphi %s1789_s22, %s2295_s22   ;;  %s1706_s21 = sphi %s1787_s21, %s2294_s21   ;;  %s1702_s20 = sphi %s1785_s20, %s2293_s20   ;;  %s1698_s19 = sphi %s1783_s19, %s2292_s19   ;;  %s1694_s18 = sphi %s1781_s18, %s2291_s18  }
  0x13   : > { %2263 = sst [smem:[#allocation29_spill]] %s1730_s27  ;;  %p53_p0 = scmp.ne.s32.totalorder %s1714_s23, %s1710_s22 }
  0x14   : > { %p54_p1 = scmp.eq.s32.totalorder %s1734_s28, 0  ;;  %p59_p2 = scmp.ne.s32.totalorder %s1710_s22, %s1706_s21 }
  0x15   : > { %p60_p3 = scmp.eq.s32.totalorder %s1835_s29, 0  ;;  %p1308_p5 = scmp.lt.s32.totalorder %s1734_s28, 16 }
  0x16   : > { %p55_p4 = por %p54_p1, %p53_p0  ;;  %s203_s8 = sand.u32 1, %s1714_s23  }
  0x17   : > { %p1849_p6 = por %p60_p3, %p59_p2  ;;  %s1188_s9 = sshll.u32 %s203_s8, 4 }
  0x18   : > { %s1258_s10 = sshll.u32 %s1730_s27, 4  ;;  %p1857_p7 = pnand %p1308_p5, %p55_p4 }
  0x19   : > { %s226_s12 = sand.u32 1, %s1734_s28   ;;  %s2266_s1 = sld [smem:[#allocation34_spill]] }
  0x1a   : > { %s230_s17 = scalar_lea.vmem [#allocation14], %s1188_s9  ;;  %s1865_s6 = scalar_lea.sflag [#allocation15], %s226_s12 }
  0x1b   : > { %s239_s21 = sshll.u32 %s230_s17, 4  ;;  %s2249_s30 = smov 128   ;;  %s240_s21 = int_to_ptr.vmem [resolvable:$true] %s239_s21 }
  0x1c   : > { %s2251_s5 = smov 8   ;;  %p1204_p8 = scmp.ge.s32.totalorder %s1734_s28, 1 }
  0x1d   : > { %p293_p9 = scmp.lt.s32.totalorder %s1734_s28, 17  ;;  %s2268_s0 = sld [smem:[#allocation33_spill]] }
  0x1e   : > { %s36_s4 = sadd.s32 1, %s1726_s26  ;;  %s98_s12 = sadd.s32 1, %s1702_s20 }
  0x1f   : > { %s236_s15 = scalar_lea.hbm %s2266_s1, %s1258_s10  ;;  %p1875_p10 = pnand %p1204_p8, %p293_p9 }
  0x20   : > { %s237_s16 = sshll.u32 %s236_s15, 4  ;;  %s207_s1 = scalar_lea.vmem [#allocation11], %s1188_s9  ;;  %s238_s16 = int_to_ptr.hbm [resolvable:$true] %s237_s16 }
  0x21   : > { %1301 = dma.hbm_to_vmem [thread:$0]  (!%p1857_p7), %s238_s16, 256, %s240_s21, %s1865_s6, %s2249_s30, %s2249_s30, %s2251_s5  }
  0x22   : > { %s216_s16 = sshll.u32 %s207_s1, 4  ;;  %s204_s21 = scalar_lea.sflag [#allocation12], %s203_s8  ;;  %s217_s16 = int_to_ptr.vmem [resolvable:$true] %s216_s16 }
  0x23   : > { %s213_s15 = scalar_lea.hbm %s2268_s0, %s1258_s10  ;;  %p37_p11 = scmp.ge.s32.totalorder %s36_s4, 4 }
  0x24   : > { %s214_s17 = sshll.u32 %s213_s15, 4  ;;  %p105_p12 = scmp.ne.s32.totalorder %s1702_s20, %s1698_s19  ;;  %s215_s17 = int_to_ptr.hbm [resolvable:$true] %s214_s17 }
  0x25   : > { %1298 = dma.hbm_to_vmem [thread:$0]  (!%p1857_p7), %s215_s17, 256, %s217_s16, %s204_s21, %s2249_s30, %s2249_s30, %s2251_s5  }
  0x26   : > { %p111_p13 = scmp.ne.s32.totalorder %s1698_s19, %s1694_s18  ;;  %s251_s10 = sand.u32 1, %s1702_s20  }
  0x27   : > { %s2300_s4 = smov (%p37_p11, %s36_s4), 0  ;;  %s2270_s1 = sadd.s32 1, %s1730_s27 }
  0x28   : > { %2269 = sst [smem:[#allocation30_spill]] %s2300_s4  ;;  %s2302_s1 = smov (!%p37_p11, %s2270_s1), %s1730_s27 }
  0x29   : > { %s95_s8 = ssub.s32 %s1726_s26, %s2300_s4  ;;  %p1903_p0 = por %p105_p12, %p54_p1 }
  0x2a   : > { %p41_p2 = scmp.ge.s32.totalorder %s2302_s1, 4  ;;  %p96_p4 = scmp.eq.s32.totalorder %s95_s8, 0 }
  0x2b   : > { %p1909_p7 = por %p111_p13, %p60_p3  ;;  %s1196_s11 = sshll.u32 %s251_s10, 4 }
  0x2c   : > { %s2304_s1 = smov (%p41_p2, %s2302_s1), 0  ;;  %s1262_s17 = sshll.u32 %s1726_s26, 4 }
  0x2d   : > { %2273 = sst [smem:[#allocation31_spill]] %s2304_s1  ;;  %s43_s15 = ssub.s32 %s1730_s27, %s2304_s1 }
  0x2e   : > { %s1916_s14 = scalar_select %p96_p4, %s1702_s20, %s98_s12  }
  0x2f   : > { %p44_p1 = scmp.eq.s32.totalorder %s43_s15, 0  ;;  %s259_s30 = scalar_lea.hbm %s2245_s2, %s1262_s17 }
  0x30   : > { %2274 = sst [smem:[#allocation32_spill]] %s1916_s14  ;;  %s253_s8 = scalar_lea.vmem [#allocation16], %s1196_s11 }
  0x31   : > { %s262_s5 = sshll.u32 %s253_s8, 4  ;;  %s2275_s0 = sadd.s32 1, %s1714_s23  ;;  %s263_s5 = int_to_ptr.vmem [resolvable:$true] %s262_s5 }
  0x32   : > { %s1927_s4 = scalar_select %p44_p1, %s1714_s23, %s2275_s0  }
  0x33   : > { %s260_s24 = sshll.u32 %s259_s30, 4  ;;  %p1302_p3 = pnand %p1308_p5, %p1903_p0  ;;  %s261_s24 = int_to_ptr.hbm [resolvable:$true] %s260_s24 }
  0x34   : > { %s282_s15 = scalar_lea.hbm %s2246_s3, %s1262_s17  ;;  %s2276_s1 = smov 8  }
  0x35   : > { %s2277_s27 = smov 128   ;;  %s283_s16 = sshll.u32 %s282_s15, 4  ;;  %s284_s16 = int_to_ptr.hbm [resolvable:$true] %s283_s16 }
  0x36   : > { %1304 = dma.hbm_to_vmem [thread:$0]  (!%p1302_p3), %s261_s24, 256, %s263_s5, %s1865_s6, %s2277_s27, %s2277_s27, %s2276_s1  }
  0x37   : > { %s276_s21 = scalar_lea.vmem [#allocation17], %s1196_s11  ;;  %s273_s0 = scalar_lea.sflag [#allocation18], %s251_s10 }
  0x38   : > { %s285_s8 = sshll.u32 %s276_s21, 4  ;;  %297 = sbr.rel (%p1875_p10) target bundleno = 1846 (0x736), region = 36  ;;  %s286_s8 = int_to_ptr.vmem [resolvable:$true] %s285_s8 }
  0x39   : > { %1307 = dma.hbm_to_vmem [thread:$0]  (!%p1302_p3), %s284_s16, 256, %s286_s8, %s273_s0, %s2277_s27, %s2277_s27, %s2276_s1  }
  0x3a   : > { %s299_s30 = sand.u32 (!%p1875_p10), 1, %s1710_s22  }
  0x3b   : > { %s1205_s9 = sshll.u32 (!%p1875_p10), %s299_s30, 4  ;;  %s300_s14 = scalar_lea.sflag (!%p1875_p10), [#allocation12], %s299_s30 }
  0x3c   : > { %s1946_s17 = scalar_lea.vmem (!%p1875_p10), [#allocation11], %s1205_s9 }
  0x3d   : > { %1669 = dma.done.wait (%p1849_p6), %s300_s14, 256  }
  0x3e   : > { %1671 = vsyncadd (%p1849_p6), %s300_s14, 4294967040  ;;  %s309_s5 = sand.u32 1, %s1835_s29   ;;  %s1953_s27 = scalar_lea.vmem [#allocation14], %s1205_s9 }
  0x3f   : > { %s310_s24 = scalar_lea.sflag [#allocation15], %s309_s5 }
  0x40   : > { %1673 = dma.done.wait (%p1849_p6), %s310_s24, 256  }
  0x41   : > { %1675 = vsyncadd (%p1849_p6), %s310_s24, 4294967040  ;;  %s321_s6 = sand.u32 1, %s1698_s19  }
  0x42   : > { %s1207_s13 = sshll.u32 %s321_s6, 4 }
  0x43   : > { %s1960_s10 = scalar_lea.vmem [#allocation16], %s1207_s13 }
  0x44   : > { %1677 = dma.done.wait (%p1909_p7), %s310_s24, 256  }
  0x45   : > { %1679 = vsyncadd (%p1909_p7), %s310_s24, 4294967040  ;;  %s330_s1 = scalar_lea.sflag [#allocation18], %s321_s6  ;;  %s1966_s11 = scalar_lea.vmem [#allocation17], %s1207_s13 }
  0x46   : > { %1681 = dma.done.wait (%p1909_p7), %s330_s1, 256  }
  0x47   : > { %1683 = vsyncadd (%p1909_p7), %s330_s1, 4294967040  ;;  %s2278_s7 = sld [smem:[#allocation28_spill]]  ;;  %p376_p5 = scmp.eq.s32.totalorder %s1722_s25, 0 }
  0x4d   : > { %p377_p6 = scmp.eq.s32.totalorder %s2278_s7, 0 }
  0x4f   : > { %p378_p8 = pnand %p377_p6, %p376_p5 }
  0x50   : > { %s1739_s12 = smov (!%p378_p8), 0.0  }
  0x51   : > { %381 = sbr.rel (%p378_p8) target bundleno = 95 (0x5f), region = 56  ;;  %392 = sst [smem:[#allocation10]] (!%p378_p8), %s1739_s12 }
  0x52   : > { %394 = sst [smem:[#allocation10 + $0x1]] (!%p378_p8), %s1739_s12 }
  0x56   : > { %vm382_vm0 = vcmask 122880   ;;  %v1738_v0 = vmov -1e+30   ;;  %v1740_v1 = vmov 0.0  }
  0x57   : > { %383 = vst.msk [vmem:[#allocation7] sm:$0x1] %vm382_vm0, %v1738_v0 }
  0x58   : > { %384 = vst.msk [vmem:[#allocation7 + $0x1] sm:$0x1] %vm382_vm0, %v1738_v0 }
  0x59   : > { %385 = vst.msk [vmem:[#allocation7 + $0x2] sm:$0x1] %vm382_vm0, %v1738_v0 }
  0x5a   : > { %386 = vst.msk [vmem:[#allocation7 + $0x3] sm:$0x1] %vm382_vm0, %v1738_v0 }
  0x5b   : > { %387 = vst.msk [vmem:[#allocation8] sm:$0x1] %vm382_vm0, %v1740_v1 }
  0x5c   : > { %388 = vst.msk [vmem:[#allocation8 + $0x1] sm:$0x1] %vm382_vm0, %v1740_v1 }
  0x5d   : > { %389 = vst.msk [vmem:[#allocation8 + $0x2] sm:$0x1] %vm382_vm0, %v1740_v1 }
  0x5e   : > { %390 = vst.msk [vmem:[#allocation8 + $0x3] sm:$0x1] %vm382_vm0, %v1740_v1 }
  0x5f PF: > { %s2279_s18 = sld [smem:[#allocation28_spill]] }
  0x65   : > { %p1209_p9 = scmp.ne.s32.totalorder %s2279_s18, 0 }
  0x67   : > { %397 = sbr.rel (%p1209_p9) target bundleno = 117 (0x75), region = 60 }
  0x6c   : > { %vm398_vm1 = vcmask 7168   ;;  %v1741_v2 = vmov -1e+30   ;;  %v1742_v3 = vmov 0.0   ;;  %v1743_v4 = vmov 0  }
  0x6d   : > { %399 = vst.msk [vmem:[#allocation2] sm:$0xff] %vm398_vm1, %v1741_v2 }
  0x6e   : > { %400 = vst.msk [vmem:[#allocation2 + $0x8] sm:$0xff] %vm398_vm1, %v1741_v2 }
  0x6f   : > { %403 = vst.msk [vmem:[#allocation5] sm:$0xff] %vm398_vm1, %v1741_v2 }
  0x70   : > { %404 = vst.msk [vmem:[#allocation5 + $0x8] sm:$0xff] %vm398_vm1, %v1741_v2 }
  0x71   : > { %401 = vst.msk [vmem:[#allocation3] sm:$0xff] %vm398_vm1, %v1742_v3 }
  0x72   : > { %402 = vst.msk [vmem:[#allocation3 + $0x8] sm:$0xff] %vm398_vm1, %v1742_v3 }
  0x73   : > { %405 = vst.msk [vmem:[#allocation6] sm:$0xff] %vm398_vm1, %v1743_v4 }
  0x74   : > { %406 = vst.msk [vmem:[#allocation6 + $0x8] sm:$0xff] %vm398_vm1, %v1743_v4 }
  0x75 PF: > { %v1220_v5 = vld [vmem:[%s1966_s11] sm:$0xf]  ;;  %v1272_v6 = vld [vmem:[%s1966_s11 + $0x4] sm:$0xf0]  ;;  %v1271_v7 = vld [vmem:[%s1966_s11 + $0x4] sm:$0xf] }
  0x76   : > { %v1221_v8 = vor.u32 %v1272_v6, %v1220_v5  ;;  %v1222_v9 = vld [vmem:[%s1966_s11 + $0x8] sm:$0xf0]  ;;  %v1212_v11 = vld [vmem:[%s1946_s17] sm:$0xf]  ;;  %v1266_v12 = vld [vmem:[%s1946_s17 + $0x4] sm:$0xf0]  ;;  %v539_v5 = vlaneseq }
  0x77   : > { %v1225_v10 = vor.u32 %v1271_v7, %v1222_v9  ;;  %v1265_v13 = vld [vmem:[%s1946_s17 + $0x4] sm:$0xf]  ;;  %v1214_v14 = vld [vmem:[%s1946_s17 + $0x8] sm:$0xf0]  ;;  %v1983_v15 = vor.u32 %v1266_v12, %v1212_v11  ;;  %s2280_s15 = sld [smem:[#allocation28_spill]]  ;;  %vm541_vm2 = vcmask 130048  }
  0x78   : > { %442 = vmatpush.bf16.xpose.msra.mxu0 %v1221_v8  ;;  %v1985_v16 = vor.u32 %v1265_v13, %v1214_v14  ;;  %vm626_vm3 = vcmask 122880   ;;  %v1744_v56 = vmov 0   ;;  %v1228_v57 = vld [vmem:[%s1960_s10] sm:$0xf]  ;;  %v1270_v58 = vld [vmem:[%s1960_s10 + $0x4] sm:$0xf0] }
  0x79   : > { %456 = vmatpush.bf16.xpose.msra.mxu1 %v1225_v10  ;;  %1416 = vset.pattern.permute.xlu1 %v1744_v56  ;;  %v1269_v59 = vld [vmem:[%s1960_s10 + $0x4] sm:$0xf]  ;;  %v1229_v60 = vor.u32 %v1270_v58, %v1228_v57  ;;  %v1230_v61 = vld [vmem:[%s1960_s10 + $0x8] sm:$0xf0]  ;;  %v1236_v62 = vld [vmem:[%s1953_s27] sm:$0xf] }
  0x7a   : > { %1417 = vset.pattern.permute.xlu0 %v1744_v56  ;;  %v1268_v63 = vld [vmem:[%s1953_s27 + $0x4] sm:$0xf0]  ;;  %v1233_v0 = vor.u32 %v1269_v59, %v1230_v61  ;;  %v1267_v2 = vld [vmem:[%s1953_s27 + $0x4] sm:$0xf]  ;;  %v1238_v3 = vld [vmem:[%s1953_s27 + $0x8] sm:$0xf0] }
  0x7b   : > { %v1237_v1 = vor.u32 %v1268_v63, %v1236_v62  ;;  %480 = vmatpush.bf16.xpose.msra.mxu2 %v1229_v60  ;;  %v1241_v4 = vor.u32 %v1267_v2, %v1238_v3  ;;  %v2023_v6 = vld [vmem:[#allocation5] sm:$0xff]  ;;  %v2025_v7 = vld [vmem:[#allocation2] sm:$0xff]  ;;  %vm586_vm4 = vcmask 7168  }
  0x7c   : > { %494 = vmatpush.bf16.xpose.msra.mxu3 %v1233_v0  ;;  %v552_v0 = vld [vmem:[#allocation3] sm:$0xff] }
  0x7d   : > { %s1998_s16 = scalar_lea.vmem [#allocation7], %s2280_s15  ;;  %s2008_s21 = scalar_lea.vmem [#allocation8], %s2280_s15 }
  0x7e   : > { %v599_v31 = vld [vmem:[%s1998_s16] sm:$0x1]  ;;  %s1242_s8 = sshll.u32 %s2280_s15, 4  ;;  %p1243_p10 = scmp.eq.s32.totalorder %s1722_s25, %s2280_s15 }
  0x7f   : > { %443 = vmatmul.bf16.vlgmr.msra.gmra.mxu0 %v1983_v15  ;;  %v602_v51 = vld [vmem:[%s2008_s21] sm:$0x1]  ;;  %v664_v3 = vstv %s1242_s8 }
  0x80   : > { %518 = vmatpush.bf16.xpose.msrb.mxu0 %v1221_v8  ;;  %457 = vmatmul.bf16.vlgmr.msra.gmra.mxu1 %v1985_v16  ;;  %v2028_v8 = vand.u32 127, %v539_v5 }
  0x81   : > { %532 = vmatpush.bf16.xpose.msrb.mxu1 %v1225_v10 }
  0x82   : > { %481 = vmatmul.bf16.vlgmr.msra.gmra.mxu2 %v1983_v15 }
  0x83   : > { %495 = vmatmul.bf16.vlgmr.msra.gmra.mxu3 %v1985_v16 }
  0x8f   : > { %519 = vmatmul.bf16.vlgmr.msrb.gmra.mxu0 %v1237_v1 }
  0x90   : > { %533 = vmatmul.bf16.vlgmr.msrb.gmra.mxu1 %v1241_v4 }
  0xfc   : > { %v444_v17 = vpop.f32.mrf.mxu0 }
  0xfd   : > { %v458_v18 = vpop.f32.mrf.mxu1 }
  0xfe   : > { %v1989_v19 = vadd.f32 %v458_v18, %v444_v17  ;;  %v2053_v17 = vld [vmem:[#allocation5 + $0x8] sm:$0xff]  ;;  %v549_v18 = vld [vmem:[#allocation2 + $0x8] sm:$0xff] }
 0x100   : > { %v542_v20 = vsel %vm541_vm2, %v1989_v19, -inf }
 0x101   : > { %543 = vmax.xlane.f32.xlu0 %v542_v20 }
 0x104   : > { %v446_v21 = vpop.f32.mrf.mxu0 }
 0x105   : > { %v460_v22 = vpop.f32.mrf.mxu1 }
 0x106   : > { %v1993_v23 = vadd.f32 %v460_v22, %v446_v21 }
 0x108   : > { %v545_v24 = vsel %vm541_vm2, %v1993_v23, -inf }
 0x109   : > { %546 = vmax.xlane.f32.xlu0 %v545_v24  ;;  %v591_v25 = vmax.f32 %v542_v20, %v545_v24 }
 0x10b   : > { %v592_v26 = vrot.slane %v591_v25, 4 }
 0x10d   : > { %v593_v27 = vmax.f32 %v591_v25, %v592_v26 }
 0x10f   : > { %v594_v28 = vrot.slane %v593_v27, 2 }
 0x111   : > { %v595_v29 = vmax.f32 %v593_v27, %v594_v28 }
 0x113   : > { %v596_v30 = vrot.slane %v595_v29, 1 }
 0x115   : > { %v597_v32 = vmax.f32 %v595_v29, %v596_v30  ;;  %v520_v29 = vpop.f32.mrf.mxu0  ;;  %v534_v30 = vpop.f32.mrf.mxu1 }
 0x117   : > { %v600_v33 = vmax.f32 %v599_v31, %v597_v32 }
 0x119   : > { %v608_v34 = vperm.slane %v600_v33, 0  ;;  %628 = vst.msk [vmem:[%s1998_s16] sm:$0x1] %vm626_vm3, %v600_v33  ;;  %v603_v39 = vsub.f32 %v599_v31, %v600_v33  ;;  %v2071_v31 = vadd.f32 %v534_v30, %v520_v29 }
 0x11b   : > { %v610_v35 = vsub.f32 %v1989_v19, %v608_v34  ;;  %v611_v36 = vsub.f32 %v1993_v23, %v608_v34  ;;  %v604_v43 = vmul.f32 1.442695, %v603_v39 }
 0x11d   : > { %v612_v37 = vmul.f32 1.442695, %v610_v35  ;;  %v614_v38 = vmul.f32 1.442695, %v611_v36  ;;  %v522_v56 = vpop.f32.mrf.mxu0  ;;  %v536_v57 = vpop.f32.mrf.mxu1 }
 0x11e   : > { %v2081_v58 = vadd.f32 %v536_v57, %v522_v56 }
 0x11f   : > { %1418 = vpow2.f32 %v612_v37 }
 0x120   : > { %1420 = vpow2.f32 %v614_v38 }
 0x121   : > { %1422 = vpow2.f32 %v604_v43 }
 0x125   : > { %v1419_v40 = vpop.eup %1418 }
 0x126   : > { %v1421_v41 = vpop.eup %1420  ;;  %v616_v42 = vsel %vm541_vm2, %v1419_v40, 0.0 }
 0x127   : > { %v617_v44 = vsel %vm541_vm2, %v1421_v41, 0.0  ;;  %v1423_v50 = vpop.eup %1422  ;;  %v482_v41 = vpop.f32.mrf.mxu2 }
 0x128   : > { %v618_v45 = vadd.f32 %v617_v44, %v616_v42  ;;  %v606_v53 = vmul.f32 %v1423_v50, %v602_v51  ;;  %v496_v42 = vpop.f32.mrf.mxu3 }
 0x129   : > { %v2075_v44 = vadd.f32 %v496_v42, %v482_v41 }
 0x12a   : > { %v619_v46 = vrot.slane %v618_v45, 4 }
 0x12c   : > { %v620_v47 = vadd.f32 %v619_v46, %v618_v45 }
 0x12e   : > { %v621_v48 = vrot.slane %v620_v47, 2 }
 0x130   : > { %v622_v49 = vadd.f32 %v621_v48, %v620_v47 }
 0x132   : > { %v623_v52 = vrot.slane %v622_v49, 1 }
 0x134   : > { %v624_v54 = vadd.f32 %v623_v52, %v622_v49 }
 0x136   : > { %v625_v55 = vadd.f32 %v624_v54, %v606_v53  ;;  %v484_v53 = vpop.f32.mrf.mxu2  ;;  %v498_v54 = vpop.f32.mrf.mxu3 }
 0x138   : > { %627 = vst.msk [vmem:[%s2008_s21] sm:$0x1] %vm626_vm3, %v625_v55  ;;  %v2079_v55 = vadd.f32 %v498_v54, %v484_v53 }
 0x174   : > { %v2030_v9 = vpop.xlane.xlu0 %543 }
 0x175   : > { %vm669_vm5 = vcmp.gt.f32.partialorder %v2030_v9, %v2023_v6  ;;  %v2036_v10 = vmax.f32 %v2025_v7, %v2030_v9  ;;  %vm629_vm6 = vcmp.eq.f32.partialorder %v1989_v19, %v2030_v9 }
 0x176   : > { %v679_v11 = vsel %vm669_vm5, %v2030_v9, %v2023_v6  ;;  %v631_v12 = vsel %vm629_vm6, %v2028_v8, 16 }
 0x177   : > { %681 = vst.msk [vmem:[#allocation5] sm:$0xff] %vm586_vm4, %v679_v11  ;;  %564 = vperm.xlu1 %1416, %v2036_v10   ;;  %v554_v13 = vsub.f32 %v2025_v7, %v2036_v10  ;;  %v633_v14 = vsel %vm541_vm2, %v631_v12, 2147483647 }
 0x178   : > { %589 = vst.msk [vmem:[#allocation2] sm:$0xff] %vm586_vm4, %v2036_v10  ;;  %v635_v15 = vshra.s32 %v633_v14, 16  ;;  %v634_v34 = vand.u32 65535, %v633_v14  ;;  %v671_v10 = vld [vmem:[#allocation6] sm:$0xff] }
 0x179   : > { %v556_v59 = vmul.f32 1.442695, %v554_v13 }
 0x17a   : > { %v637_v16 = vcvt.s32.f32 %v635_v15  ;;  %v636_v37 = vcvt.s32.f32 %v634_v34 }
 0x17c   : > { %638 = vmin.xlane.f32.xlu2 %v637_v16  ;;  %v2055_v20 = vpop.xlane.xlu0 %546 }
 0x17d   : > { %vm670_vm7 = vcmp.gt.f32.partialorder %v2055_v20, %v2053_v17  ;;  %v551_v21 = vmax.f32 %v549_v18, %v2055_v20  ;;  %vm630_vm8 = vcmp.eq.f32.partialorder %v1993_v23, %v2055_v20 }
 0x17e   : > { %v680_v22 = vsel %vm670_vm7, %v2055_v20, %v2053_v17  ;;  %v632_v24 = vsel %vm630_vm8, %v2028_v8, 16 }
 0x17f   : > { %682 = vst.msk [vmem:[#allocation5 + $0x8] sm:$0xff] %vm586_vm4, %v680_v22  ;;  %569 = vperm.xlu1 %1416, %v551_v21   ;;  %v555_v25 = vsub.f32 %v549_v18, %v551_v21  ;;  %v648_v26 = vsel %vm541_vm2, %v632_v24, 2147483647 }
 0x180   : > { %590 = vst.msk [vmem:[#allocation2 + $0x8] sm:$0xff] %vm586_vm4, %v551_v21  ;;  %v650_v27 = vshra.s32 %v648_v26, 16  ;;  %v649_v43 = vand.u32 65535, %v648_v26  ;;  %v553_v21 = vld [vmem:[#allocation3 + $0x8] sm:$0xff] }
 0x181   : > { %v558_v61 = vmul.f32 1.442695, %v555_v25 }
 0x182   : > { %v652_v28 = vcvt.s32.f32 %v650_v27  ;;  %v651_v49 = vcvt.s32.f32 %v649_v43  ;;  %v672_v27 = vld [vmem:[#allocation6 + $0x8] sm:$0xff] }
 0x184   : > { %653 = vmin.xlane.f32.xlu2 %v652_v28 }
 0x1e9   : > { %v565_v32 = vpop.permute.xlu1 %564 }
 0x1ea   : > { %v572_v33 = vsub.f32 %v1989_v19, %v565_v32 }
 0x1ec   : > { %v574_v35 = vmul.f32 1.442695, %v572_v33 }
 0x1ee   : > { %1424 = vpow2.f32 %v574_v35 }
 0x1ef   : > { %v639_v36 = vpop.xlane.xlu2 %638 }
 0x1f0   : > { %vm640_vm9 = vcmp.eq.f32.partialorder %v637_v16, %v639_v36  ;;  %v645_v60 = vcvt.f32.s32 %v639_v36 }
 0x1f1   : > { %v570_v38 = vpop.permute.xlu1 %569  ;;  %v641_v39 = vsel %vm640_vm9, %v636_v37, inf }
 0x1f2   : > { %v573_v40 = vsub.f32 %v1993_v23, %v570_v38  ;;  %642 = vmin.xlane.f32.xlu0 %v641_v39  ;;  %v646_v1 = vshll.u32 %v645_v60, 16 }
 0x1f4   : > { %v1425_v45 = vpop.eup %1424  ;;  %v576_v46 = vmul.f32 1.442695, %v573_v40 }
 0x1f5   : > { %v578_v47 = vsel %vm541_vm2, %v1425_v45, 0.0 }
 0x1f6   : > { %1426 = vpow2.f32 %v576_v46  ;;  %579 = vadd.xlane.f32.xlu2 %v578_v47 }
 0x1f7   : > { %v654_v48 = vpop.xlane.xlu2 %653  ;;  %1428 = vpow2.f32 %v556_v59 }
 0x1f8   : > { %vm655_vm10 = vcmp.eq.f32.partialorder %v652_v28, %v654_v48  ;;  %1430 = vpow2.f32 %v558_v61  ;;  %v660_v12 = vcvt.f32.s32 %v654_v48 }
 0x1f9   : > { %v656_v50 = vsel %vm655_vm10, %v651_v49, inf }
 0x1fa   : > { %657 = vmin.xlane.f32.xlu1 %v656_v50  ;;  %v661_v22 = vshll.u32 %v660_v12, 16 }
 0x1fc   : > { %v1427_v51 = vpop.eup %1426 }
 0x1fd   : > { %v581_v52 = vsel %vm541_vm2, %v1427_v51, 0.0  ;;  %v1429_v62 = vpop.eup %1428 }
 0x1fe   : > { %582 = vadd.xlane.f32.xlu0 %v581_v52  ;;  %v560_v7 = vmul.f32 %v1429_v62, %v552_v0  ;;  %v1431_v16 = vpop.eup %1430 }
 0x1ff   : > { %v561_v26 = vmul.f32 %v1431_v16, %v553_v21 }
 0x265   : > { %v643_v63 = vpop.xlane.xlu0 %642 }
 0x266   : > { %v644_v2 = vcvt.f32.s32 %v643_v63 }
 0x268   : > { %v647_v4 = vadd.s32 %v646_v1, %v644_v2 }
 0x269   : > { %v580_v11 = vpop.xlane.xlu2 %579 }
 0x26a   : > { %v665_v14 = vadd.s32 %v664_v3, %v647_v4  ;;  %v584_v15 = vadd.f32 %v580_v11, %v560_v7 }
 0x26c   : > { %v673_v13 = vsel %vm669_vm5, %v665_v14, %v671_v10  ;;  %587 = vst.msk [vmem:[#allocation3] sm:$0xff] %vm586_vm4, %v584_v15 }
 0x26d   : > { %675 = vst.msk [vmem:[#allocation6] sm:$0xff] %vm586_vm4, %v673_v13  ;;  %v658_v18 = vpop.xlane.xlu1 %657 }
 0x26e   : > { %v659_v24 = vcvt.f32.s32 %v658_v18 }
 0x270   : > { %v662_v25 = vadd.s32 %v661_v22, %v659_v24 }
 0x271   : > { %v583_v28 = vpop.xlane.xlu0 %582  ;;  %686 = sbr.rel (%p1243_p10) target bundleno = 1003 (0x3eb), region = 64 }
 0x272   : > { %v666_v29 = vadd.s32 %v664_v3, %v662_v25  ;;  %v585_v30 = vadd.f32 %v583_v28, %v561_v26 }
 0x274   : > { %v674_v6 = vsel %vm670_vm7, %v666_v29, %v672_v27  ;;  %588 = vst.msk [vmem:[#allocation3 + $0x8] sm:$0xff] %vm586_vm4, %v585_v30 }
 0x275   : > { %676 = vst.msk [vmem:[#allocation6 + $0x8] sm:$0xff] %vm586_vm4, %v674_v6 }
 0x276   : > { %v687_v9 = vsel %vm541_vm2, %v2075_v44, -inf  ;;  %v690_v32 = vsel %vm541_vm2, %v2079_v55, -inf  ;;  %v1745_v33 = vmov 0   ;;  %v2100_v17 = vld [vmem:[#allocation2] sm:$0xff]  ;;  %v694_v36 = vld [vmem:[#allocation2 + $0x8] sm:$0xff]  ;;  %v735_v51 = vsel %vm541_vm2, %v2071_v31, -inf }
 0x277   : > { %688 = vmax.xlane.f32.xlu0 %v687_v9  ;;  %1432 = vset.pattern.permute.xlu1 %v1745_v33  ;;  %v736_v52 = vsel %vm541_vm2, %v2081_v58, -inf  ;;  %v744_v62 = vld [vmem:[%s1998_s16] sm:$0x1] }
 0x278   : > { %1433 = vset.pattern.permute.xlu0 %v1745_v33  ;;  %v737_v53 = vmax.f32 %v735_v51, %v736_v52  ;;  %v746_v25 = vld [vmem:[%s2008_s21] sm:$0x1] }
 0x27a   : > { %v738_v54 = vrot.slane %v737_v53, 4 }
 0x27c   : > { %v739_v56 = vmax.f32 %v737_v53, %v738_v54 }
 0x27e   : > { %v740_v57 = vrot.slane %v739_v56, 2 }
 0x27f   : > { %691 = vmax.xlane.f32.xlu0 %v690_v32  ;;  %v697_v32 = vld [vmem:[#allocation3] sm:$0xff] }
 0x280   : > { %v741_v59 = vmax.f32 %v739_v56, %v740_v57 }
 0x282   : > { %v742_v60 = vrot.slane %v741_v59, 1 }
 0x284   : > { %v743_v61 = vmax.f32 %v741_v59, %v742_v60 }
 0x286   : > { %v745_v63 = vmax.f32 %v744_v62, %v743_v61 }
 0x288   : > { %v752_v0 = vperm.slane %v745_v63, 0  ;;  %771 = vst.msk [vmem:[%s1998_s16] sm:$0x1] %vm626_vm3, %v745_v63  ;;  %v747_v14 = vsub.f32 %v744_v62, %v745_v63 }
 0x28a   : > { %v754_v1 = vsub.f32 %v2071_v31, %v752_v0  ;;  %v755_v2 = vsub.f32 %v2081_v58, %v752_v0  ;;  %v748_v13 = vmul.f32 1.442695, %v747_v14 }
 0x28c   : > { %v756_v3 = vmul.f32 1.442695, %v754_v1  ;;  %v758_v4 = vmul.f32 1.442695, %v755_v2 }
 0x2ea   : > { %v689_v20 = vpop.xlane.xlu0 %688 }
 0x2eb   : > { %v695_v34 = vmax.f32 %v2100_v17, %v689_v20 }
 0x2ed   : > { %v699_v35 = vsub.f32 %v2100_v17, %v695_v34  ;;  %733 = vst.msk [vmem:[#allocation2] sm:$0xff] %vm586_vm4, %v695_v34  ;;  %709 = vperm.xlu1 %1432, %v695_v34  }
 0x2ef   : > { %v701_v30 = vmul.f32 1.442695, %v699_v35 }
 0x2f2   : > { %v692_v37 = vpop.xlane.xlu0 %691 }
 0x2f3   : > { %v696_v38 = vmax.f32 %v694_v36, %v692_v37 }
 0x2f5   : > { %v700_v39 = vsub.f32 %v694_v36, %v696_v38  ;;  %734 = vst.msk [vmem:[#allocation2 + $0x8] sm:$0xff] %vm586_vm4, %v696_v38  ;;  %714 = vperm.xlu1 %1432, %v696_v38   ;;  %v698_v36 = vld [vmem:[#allocation3 + $0x8] sm:$0xff] }
 0x2f7   : > { %v703_v6 = vmul.f32 1.442695, %v700_v39 }
 0x35f   : > { %v710_v40 = vpop.permute.xlu1 %709 }
 0x360   : > { %v717_v41 = vsub.f32 %v2075_v44, %v710_v40 }
 0x362   : > { %v719_v42 = vmul.f32 1.442695, %v717_v41 }
 0x364   : > { %1434 = vpow2.f32 %v719_v42 }
 0x367   : > { %v715_v43 = vpop.permute.xlu1 %714 }
 0x368   : > { %v718_v45 = vsub.f32 %v2079_v55, %v715_v43 }
 0x36a   : > { %v1435_v46 = vpop.eup %1434  ;;  %v721_v47 = vmul.f32 1.442695, %v718_v45 }
 0x36b   : > { %v723_v48 = vsel %vm541_vm2, %v1435_v46, 0.0 }
 0x36c   : > { %1436 = vpow2.f32 %v721_v47  ;;  %724 = vadd.xlane.f32.xlu2 %v723_v48 }
 0x36d   : > { %1438 = vpow2.f32 %v756_v3 }
 0x36e   : > { %1440 = vpow2.f32 %v758_v4 }
 0x36f   : > { %1442 = vpow2.f32 %v748_v13 }
 0x370   : > { %1444 = vpow2.f32 %v701_v30 }
 0x371   : > { %1446 = vpow2.f32 %v703_v6 }
 0x372   : > { %v1437_v49 = vpop.eup %1436 }
 0x373   : > { %v726_v50 = vsel %vm541_vm2, %v1437_v49, 0.0  ;;  %v1439_v7 = vpop.eup %1438 }
 0x374   : > { %727 = vadd.xlane.f32.xlu2 %v726_v50  ;;  %v1441_v10 = vpop.eup %1440  ;;  %v760_v11 = vsel %vm541_vm2, %v1439_v7, 0.0 }
 0x375   : > { %v761_v12 = vsel %vm541_vm2, %v1441_v10, 0.0  ;;  %v1443_v24 = vpop.eup %1442 }
 0x376   : > { %v762_v15 = vadd.f32 %v761_v12, %v760_v11  ;;  %v750_v27 = vmul.f32 %v1443_v24, %v746_v25  ;;  %v1445_v9 = vpop.eup %1444 }
 0x377   : > { %v705_v33 = vmul.f32 %v1445_v9, %v697_v32  ;;  %v1447_v34 = vpop.eup %1446 }
 0x378   : > { %v763_v16 = vrot.slane %v762_v15, 4  ;;  %v706_v37 = vmul.f32 %v1447_v34, %v698_v36 }
 0x37a   : > { %v764_v18 = vadd.f32 %v763_v16, %v762_v15 }
 0x37c   : > { %v765_v21 = vrot.slane %v764_v18, 2 }
 0x37e   : > { %v766_v22 = vadd.f32 %v765_v21, %v764_v18 }
 0x380   : > { %v767_v26 = vrot.slane %v766_v22, 1 }
 0x382   : > { %v768_v28 = vadd.f32 %v767_v26, %v766_v22 }
 0x384   : > { %v769_v29 = vadd.f32 %v768_v28, %v750_v27 }
 0x386   : > { %770 = vst.msk [vmem:[%s2008_s21] sm:$0x1] %vm626_vm3, %v769_v29 }
 0x3df   : > { %v725_v17 = vpop.xlane.xlu2 %724 }
 0x3e0   : > { %v729_v20 = vadd.f32 %v725_v17, %v705_v33 }
 0x3e2   : > { %731 = vst.msk [vmem:[#allocation3] sm:$0xff] %vm586_vm4, %v729_v20 }
 0x3e7   : > { %v728_v38 = vpop.xlane.xlu2 %727 }
 0x3e8   : > { %v730_v40 = vadd.f32 %v728_v38, %v706_v37 }
 0x3ea   : > { %732 = vst.msk [vmem:[#allocation3 + $0x8] sm:$0xff] %vm586_vm4, %v730_v40 }
 0x3eb PF: > { %s2281_s0 = sld [smem:[#allocation28_spill]] }
 0x3f1   : > { %p1244_p11 = scmp.ne.s32.totalorder %s1722_s25, %s2281_s0 }
 0x3f2   : > { %s2282_s30 = sld [smem:[#allocation28_spill]] (!%p1244_p11) }
 0x3f3   : > { %775 = sbr.rel (%p1244_p11) target bundleno = 1395 (0x573), region = 68 }
 0x3f8   : > { %v2129_v35 = vshrl.u32 %v539_v5, 7  ;;  %v1746_v41 = vmov 0.0   ;;  %v844_v59 = vld [vmem:[%s1998_s16] sm:$0x1]  ;;  %v1747_v26 = vmov 0   ;;  %v794_v6 = vld [vmem:[#allocation2 + $0x8] sm:$0xff] }
 0x3f9   : > { %v846_v16 = vld [vmem:[%s2008_s21] sm:$0x1]  ;;  %1448 = vset.pattern.permute.xlu1 %v1747_v26  ;;  %1449 = vset.pattern.permute.xlu0 %v1747_v26  ;;  %s889_s9 = scalar_lea.vmem [#allocation9], %s2282_s30 }
 0x3fa   : > { %vm779_vm11 = vcmp.eq.s32.totalorder %v2028_v8, %v2129_v35  ;;  %v2134_v39 = vadd.s32 8, %v2129_v35  ;;  %v793_v27 = vld [vmem:[#allocation2] sm:$0xff] }
 0x3fb   : > { %v781_v42 = vsel %vm779_vm11, 1e+09, %v1746_v41  ;;  %v872_v17 = vsel %vm779_vm11, %v1989_v19, 0.0 }
 0x3fc   : > { %v2140_v43 = vsub.f32 %v2075_v44, %v781_v42  ;;  %v785_v45 = vsub.f32 %v2071_v31, %v781_v42  ;;  %vm780_vm12 = vcmp.eq.s32.totalorder %v2028_v8, %v2134_v39  ;;  %v874_v34 = vsel %vm541_vm2, %v872_v17, 0.0 }
 0x3fd   : > { %v782_v46 = vsel %vm780_vm12, 1e+09, %v1746_v41  ;;  %v873_v20 = vsel %vm780_vm12, %v1993_v23, 0.0 }
 0x3fe   : > { %v787_v47 = vsel %vm541_vm2, %v2140_v43, -inf  ;;  %v835_v48 = vsel %vm541_vm2, %v785_v45, -inf  ;;  %v786_v49 = vsub.f32 %v2081_v58, %v782_v46  ;;  %v2153_v44 = vsub.f32 %v2079_v55, %v782_v46 }
 0x3ff   : > { %788 = vmax.xlane.f32.xlu0 %v787_v47  ;;  %v877_v36 = vsel %vm541_vm2, %v873_v20, 0.0 }
 0x400   : > { %v836_v31 = vsel %vm541_vm2, %v786_v49, -inf  ;;  %v790_v52 = vsel %vm541_vm2, %v2153_v44, -inf  ;;  %v882_v37 = vadd.f32 %v877_v36, %v874_v34 }
 0x401   : > { %v837_v50 = vmax.f32 %v835_v48, %v836_v31 }
 0x402   : > { %v883_v38 = vrot.slane %v882_v37, 4 }
 0x403   : > { %v838_v51 = vrot.slane %v837_v50, 4 }
 0x404   : > { %v884_v40 = vadd.f32 %v883_v38, %v882_v37 }
 0x405   : > { %v839_v53 = vmax.f32 %v837_v50, %v838_v51 }
 0x406   : > { %v885_v41 = vrot.slane %v884_v40, 2 }
 0x407   : > { %v840_v54 = vrot.slane %v839_v53, 2  ;;  %791 = vmax.xlane.f32.xlu0 %v790_v52 }
 0x408   : > { %v886_v42 = vadd.f32 %v885_v41, %v884_v40 }
 0x409   : > { %v841_v56 = vmax.f32 %v839_v53, %v840_v54  ;;  %v797_v54 = vld [vmem:[#allocation3] sm:$0xff] }
 0x40a   : > { %v887_v35 = vrot.slane %v886_v42, 1 }
 0x40b   : > { %v842_v57 = vrot.slane %v841_v56, 1 }
 0x40c   : > { %v888_v47 = vadd.f32 %v887_v35, %v886_v42 }
 0x40d   : > { %v843_v60 = vmax.f32 %v841_v56, %v842_v57 }
 0x40e   : > { %890 = vst.msk [vmem:[%s889_s9] sm:$0x1] %vm626_vm3, %v888_v47 }
 0x40f   : > { %v845_v58 = vmax.f32 %v844_v59, %v843_v60  ;;  %875 = vadd.xlane.f32.xlu0 %v874_v34 }
 0x411   : > { %v852_v61 = vperm.slane %v845_v58, 0  ;;  %871 = vst.msk [vmem:[%s1998_s16] sm:$0x1] %vm626_vm3, %v845_v58  ;;  %v847_v1 = vsub.f32 %v844_v59, %v845_v58  ;;  %v798_v58 = vld [vmem:[#allocation3 + $0x8] sm:$0xff] }
 0x413   : > { %v854_v55 = vsub.f32 %v785_v45, %v852_v61  ;;  %v855_v62 = vsub.f32 %v786_v49, %v852_v61  ;;  %v848_v3 = vmul.f32 1.442695, %v847_v1 }
 0x415   : > { %v856_v63 = vmul.f32 1.442695, %v854_v55  ;;  %v858_v0 = vmul.f32 1.442695, %v855_v62 }
 0x417   : > { %1450 = vpow2.f32 %v856_v63 }
 0x418   : > { %1452 = vpow2.f32 %v858_v0 }
 0x419   : > { %1454 = vpow2.f32 %v848_v3 }
 0x41d   : > { %v1451_v2 = vpop.eup %1450 }
 0x41e   : > { %v1453_v4 = vpop.eup %1452  ;;  %v860_v7 = vsel %vm541_vm2, %v1451_v2, 0.0 }
 0x41f   : > { %v861_v10 = vsel %vm541_vm2, %v1453_v4, 0.0  ;;  %v1455_v13 = vpop.eup %1454 }
 0x420   : > { %v862_v11 = vadd.f32 %v861_v10, %v860_v7  ;;  %v850_v21 = vmul.f32 %v1455_v13, %v846_v16 }
 0x422   : > { %v863_v12 = vrot.slane %v862_v11, 4 }
 0x424   : > { %v864_v14 = vadd.f32 %v863_v12, %v862_v11 }
 0x426   : > { %v865_v15 = vrot.slane %v864_v14, 2 }
 0x428   : > { %v866_v18 = vadd.f32 %v865_v15, %v864_v14 }
 0x42a   : > { %v867_v22 = vrot.slane %v866_v18, 1 }
 0x42c   : > { %v868_v24 = vadd.f32 %v867_v22, %v866_v18 }
 0x42e   : > { %v869_v25 = vadd.f32 %v868_v24, %v850_v21 }
 0x430   : > { %870 = vst.msk [vmem:[%s2008_s21] sm:$0x1] %vm626_vm3, %v869_v25 }
 0x472   : > { %v789_v28 = vpop.xlane.xlu0 %788 }
 0x473   : > { %v795_v29 = vmax.f32 %v793_v27, %v789_v28 }
 0x475   : > { %v799_v30 = vsub.f32 %v793_v27, %v795_v29  ;;  %833 = vst.msk [vmem:[#allocation2] sm:$0xff] %vm586_vm4, %v795_v29  ;;  %809 = vperm.xlu1 %1448, %v795_v29  }
 0x477   : > { %v801_v52 = vmul.f32 1.442695, %v799_v30 }
 0x47a   : > { %v792_v9 = vpop.xlane.xlu0 %791 }
 0x47b   : > { %v796_v32 = vmax.f32 %v794_v6, %v792_v9 }
 0x47d   : > { %v800_v33 = vsub.f32 %v794_v6, %v796_v32  ;;  %834 = vst.msk [vmem:[#allocation2 + $0x8] sm:$0xff] %vm586_vm4, %v796_v32  ;;  %814 = vperm.xlu1 %1448, %v796_v32  }
 0x47f   : > { %v803_v53 = vmul.f32 1.442695, %v800_v33 }
 0x482   : > { %v876_v51 = vpop.xlane.xlu0 %875 }
 0x483   : > { %880 = vst.msk [vmem:[#allocation4] sm:$0xff] %vm586_vm4, %v876_v51 }
 0x4a7   : > { %878 = vadd.xlane.f32.xlu1 %v877_v36 }
 0x4e7   : > { %v810_v45 = vpop.permute.xlu1 %809 }
 0x4e8   : > { %v817_v19 = vsub.f32 %v2140_v43, %v810_v45 }
 0x4ea   : > { %v819_v46 = vmul.f32 1.442695, %v817_v19 }
 0x4ec   : > { %1456 = vpow2.f32 %v819_v46 }
 0x4ef   : > { %v815_v23 = vpop.permute.xlu1 %814 }
 0x4f0   : > { %v818_v8 = vsub.f32 %v2153_v44, %v815_v23 }
 0x4f2   : > { %v1457_v39 = vpop.eup %1456  ;;  %v821_v48 = vmul.f32 1.442695, %v818_v8 }
 0x4f3   : > { %v823_v49 = vsel %vm541_vm2, %v1457_v39, 0.0 }
 0x4f4   : > { %1458 = vpow2.f32 %v821_v48  ;;  %824 = vadd.xlane.f32.xlu2 %v823_v49 }
 0x4f5   : > { %1460 = vpow2.f32 %v801_v52 }
 0x4f6   : > { %1462 = vpow2.f32 %v803_v53 }
 0x4fa   : > { %v1459_v31 = vpop.eup %1458 }
 0x4fb   : > { %v826_v50 = vsel %vm541_vm2, %v1459_v31, 0.0  ;;  %v1461_v44 = vpop.eup %1460 }
 0x4fc   : > { %827 = vadd.xlane.f32.xlu2 %v826_v50  ;;  %v805_v56 = vmul.f32 %v1461_v44, %v797_v54  ;;  %v1463_v60 = vpop.eup %1462 }
 0x4fd   : > { %v806_v61 = vmul.f32 %v1463_v60, %v798_v58 }
 0x51a   : > { %v879_v43 = vpop.xlane.xlu1 %878 }
 0x51b   : > { %881 = vst.msk [vmem:[#allocation4 + $0x8] sm:$0xff] %vm586_vm4, %v879_v43 }
 0x567   : > { %v825_v57 = vpop.xlane.xlu2 %824 }
 0x568   : > { %v829_v59 = vadd.f32 %v825_v57, %v805_v56 }
 0x56a   : > { %831 = vst.msk [vmem:[#allocation3] sm:$0xff] %vm586_vm4, %v829_v59 }
 0x56f   : > { %v828_v55 = vpop.xlane.xlu2 %827 }
 0x570   : > { %v830_v62 = vadd.f32 %v828_v55, %v806_v61 }
 0x572   : > { %832 = vst.msk [vmem:[#allocation3 + $0x8] sm:$0xff] %vm586_vm4, %v830_v62 }
 0x573 PF: > { %s2283_s14 = sld [smem:[#allocation28_spill]] }
 0x579   : > { %p891_p12 = scmp.eq.s32.totalorder %s2283_s14, 3  ;;  %p1245_p13 = scmp.ne.s32.totalorder %s2283_s14, 3 }
 0x57a   : > { %s1246_s17 = sshll.u32 (!%p1245_p13), %s1722_s25, 4  ;;  %s905_s5 = sld [smem:[#allocation10]] (!%p1245_p13) }
 0x57b   : > { %894 = sbr.rel (%p1245_p13) target bundleno = 1615 (0x64f), region = 72  ;;  %s1247_s27 = sld [smem:[#allocation10 + $0x1]] (!%p1245_p13) }
 0x580   : > { %v897_v63 = vld [vmem:[#allocation3] sm:$0xff]  ;;  %v927_v0 = vshrl.u32 %v539_v5, 7  ;;  %v898_v1 = vld [vmem:[#allocation3 + $0x8] sm:$0xff]  ;;  %v929_v3 = vstv %s1246_s17  ;;  %v938_v11 = vld [vmem:[#allocation6] sm:$0xff]  ;;  %v1748_v9 = vmov 0.0  }
 0x581   : > { %1464 = vlog2.f32 %v897_v63  ;;  %v932_v10 = vld [vmem:[#allocation5] sm:$0xff]  ;;  %v895_v14 = vld [vmem:[#allocation2] sm:$0xff]  ;;  %v933_v15 = vld [vmem:[#allocation5 + $0x8] sm:$0xff] }
 0x582   : > { %1466 = vlog2.f32 %v898_v1  ;;  %v928_v2 = vadd.s32 8, %v927_v0  ;;  %v930_v4 = vadd.s32 %v929_v3, %v927_v0  ;;  %v939_v13 = vld [vmem:[#allocation6 + $0x8] sm:$0xff]  ;;  %v906_v24 = vld [vmem:[#allocation4] sm:$0xff]  ;;  %vm936_vm13 = vcmp.eq.f32.partialorder %v932_v10, %v895_v14 }
 0x583   : > { %v896_v18 = vld [vmem:[#allocation2 + $0x8] sm:$0xff] }
 0x584   : > { %v931_v7 = vadd.s32 %v929_v3, %v928_v2  ;;  %vm940_vm14 = vcmp.eq.s32.totalorder %v938_v11, %v930_v4  ;;  %v907_v25 = vld [vmem:[#allocation4 + $0x8] sm:$0xff]  ;;  %vm937_vm15 = vcmp.eq.f32.partialorder %v933_v15, %v896_v18 }
 0x585   : > { %vm942_vm1 = vmand %vm936_vm13, %vm940_vm14 }
 0x586   : > { %vm941_vm0 = vcmp.eq.s32.totalorder %v939_v13, %v931_v7  ;;  %v1248_v32 = vsel %vm942_vm1, 1.0, %v1748_v9 }
 0x587   : > { %v1465_v12 = vpop.eup %1464  ;;  %vm943_vm2 = vmand %vm937_vm15, %vm941_vm0  ;;  %v949_v17 = vsel %vm586_vm4, %v1248_v32, 0.0 }
 0x588   : > { %v1467_v16 = vpop.eup %1466  ;;  %v900_v21 = vmul.f32 0.6931472, %v1465_v12  ;;  %v1249_v33 = vsel %vm943_vm2, 1.0, %v1748_v9 }
 0x589   : > { %v902_v22 = vmul.f32 0.6931472, %v1467_v16  ;;  %v950_v20 = vsel %vm586_vm4, %v1249_v33, 0.0 }
 0x58a   : > { %v903_v5 = vadd.f32 %v900_v21, %v895_v14  ;;  %v951_v34 = vadd.f32 %v950_v20, %v949_v17 }
 0x58b   : > { %v904_v26 = vadd.f32 %v902_v22, %v896_v18 }
 0x58c   : > { %v908_v27 = vsub.f32 %v903_v5, %v906_v24 }
 0x58d   : > { %v909_v28 = vsub.f32 %v904_v26, %v907_v25 }
 0x58e   : > { %v910_v29 = vsel %vm586_vm4, %v908_v27, 0.0 }
 0x58f   : > { %v911_v30 = vsel %vm586_vm4, %v909_v28, 0.0 }
 0x590   : > { %v912_v6 = vadd.f32 %v911_v30, %v910_v29 }
 0x592   : > { %913 = vadd.xlane.f32.xlu0 %v912_v6 }
 0x59a   : > { %952 = vadd.xlane.f32.xlu0 %v951_v34 }
 0x605   : > { %v914_v36 = vpop.xlane.xlu0 %913 }
 0x606   : > { %v915_v37 = vrot.slane %v914_v36, 4 }
 0x608   : > { %v916_v38 = vadd.f32 %v915_v37, %v914_v36 }
 0x60a   : > { %v917_v40 = vrot.slane %v916_v38, 2 }
 0x60c   : > { %v918_v41 = vadd.f32 %v917_v40, %v916_v38 }
 0x60d   : > { %v953_v42 = vpop.xlane.xlu0 %952 }
 0x60e   : > { %v954_v45 = vrot.slane %v953_v42, 4  ;;  %v919_v19 = vrot.slane %v918_v41, 1 }
 0x610   : > { %v955_v35 = vadd.f32 %v954_v45, %v953_v42  ;;  %v920_v46 = vadd.f32 %v919_v19, %v918_v41 }
 0x612   : > { %v956_v47 = vrot.slane %v955_v35, 2  ;;  %1273 = vpush %v920_v46 }
 0x614   : > { %v957_v23 = vadd.f32 %v956_v47, %v955_v35 }
 0x616   : > { %v958_v8 = vrot.slane %v957_v23, 1 }
 0x618   : > { %v959_v39 = vadd.f32 %v958_v8, %v957_v23 }
 0x61a   : > { %1275 = vpush %v959_v39 }
 0x643   : > { %s1274_s24 = spop %1273 }
 0x644   : > { %s922_s6 = sadd.f32 %s1274_s24, %s905_s5 }
 0x646   : > { %924 = sst [smem:[#allocation10]] %s922_s6 }
 0x64b   : > { %s1276_s13 = spop %1275 }
 0x64c   : > { %s961_s10 = sadd.f32 %s1276_s13, %s1247_s27 }
 0x64e   : > { %963 = sst [smem:[#allocation10 + $0x1]] %s961_s10 }
 0x64f PF: > { %p964_p0 = scmp.eq.s32.totalorder %s1722_s25, 3 }
 0x651   : > { %p965_p2 = pnand %p964_p0, %p891_p12 }
 0x652   : > { %s1250_s25 = sld [smem:[#allocation10 + $0x1]] (!%p965_p2) }
 0x653   : > { %968 = sbr.rel (%p965_p2) target bundleno = 1831 (0x727), region = 76  ;;  %s1013_s12 = sld [smem:[#allocation10]] (!%p965_p2) }
 0x658   : > { %v973_v48 = vld [vmem:[#allocation8] sm:$0x1]  ;;  %v974_v49 = vld [vmem:[#allocation8 + $0x1] sm:$0x1]  ;;  %v975_v31 = vld [vmem:[#allocation8 + $0x2] sm:$0x1] }
 0x659   : > { %v976_v50 = vld [vmem:[#allocation8 + $0x3] sm:$0x1]  ;;  %1468 = vlog2.f32 %v973_v48  ;;  %v969_v51 = vld [vmem:[#allocation7] sm:$0x1]  ;;  %v970_v53 = vld [vmem:[#allocation7 + $0x1] sm:$0x1] }
 0x65a   : > { %1470 = vlog2.f32 %v974_v49  ;;  %v971_v56 = vld [vmem:[#allocation7 + $0x2] sm:$0x1]  ;;  %v989_v59 = vld [vmem:[#allocation9] sm:$0x1]  ;;  %v972_v58 = vld [vmem:[#allocation7 + $0x3] sm:$0x1] }
 0x65b   : > { %1472 = vlog2.f32 %v975_v31  ;;  %v990_v62 = vld [vmem:[#allocation9 + $0x1] sm:$0x1]  ;;  %v991_v1 = vld [vmem:[#allocation9 + $0x2] sm:$0x1]  ;;  %v992_v3 = vld [vmem:[#allocation9 + $0x3] sm:$0x1] }
 0x65c   : > { %1474 = vlog2.f32 %v976_v50  ;;  %s1020_s11 = smul.f32 100.0, %s1250_s25 }
 0x65e   : > { %s1021_s7 = smul.f32 0.015625, %s1020_s11 }
 0x65f   : > { %v1469_v43 = vpop.eup %1468 }
 0x660   : > { %v1471_v52 = vpop.eup %1470  ;;  %v978_v44 = vmul.f32 0.6931472, %v1469_v43  ;;  %1023 = sst [smem:[#allocation20]] %s1021_s7 }
 0x661   : > { %v1473_v54 = vpop.eup %1472  ;;  %v980_v57 = vmul.f32 0.6931472, %v1471_v52 }
 0x662   : > { %v1475_v60 = vpop.eup %1474  ;;  %v982_v61 = vmul.f32 0.6931472, %v1473_v54  ;;  %v985_v55 = vadd.f32 %v978_v44, %v969_v51 }
 0x663   : > { %v984_v63 = vmul.f32 0.6931472, %v1475_v60  ;;  %v986_v0 = vadd.f32 %v980_v57, %v970_v53 }
 0x664   : > { %v987_v2 = vadd.f32 %v982_v61, %v971_v56  ;;  %v993_v4 = vsub.f32 %v985_v55, %v989_v59 }
 0x665   : > { %v988_v7 = vadd.f32 %v984_v63, %v972_v58  ;;  %v994_v10 = vsub.f32 %v986_v0, %v990_v62 }
 0x666   : > { %v995_v11 = vsub.f32 %v987_v2, %v991_v1  ;;  %v997_v12 = vsel %vm626_vm3, %v993_v4, 0.0 }
 0x667   : > { %v996_v14 = vsub.f32 %v988_v7, %v992_v3  ;;  %v998_v15 = vsel %vm626_vm3, %v994_v10, 0.0 }
 0x668   : > { %v999_v13 = vadd.f32 %v998_v15, %v997_v12  ;;  %v1000_v16 = vsel %vm626_vm3, %v995_v11, 0.0 }
 0x669   : > { %v1002_v18 = vsel %vm626_vm3, %v996_v14, 0.0 }
 0x66a   : > { %v1001_v21 = vadd.f32 %v1000_v16, %v999_v13 }
 0x66c   : > { %v1003_v22 = vadd.f32 %v1002_v18, %v1001_v21 }
 0x66e   : > { %1004 = vadd.xlane.f32.xlu0 %v1003_v22 }
 0x6e1   : > { %v1005_v24 = vpop.xlane.xlu0 %1004 }
 0x6e2   : > { %v1006_v5 = vrot.slane %v1005_v24, 4 }
 0x6e4   : > { %v1007_v25 = vadd.f32 %v1006_v5, %v1005_v24 }
 0x6e6   : > { %v1008_v26 = vrot.slane %v1007_v25, 2 }
 0x6e8   : > { %v1009_v27 = vadd.f32 %v1008_v26, %v1007_v25 }
 0x6ea   : > { %v1010_v28 = vrot.slane %v1009_v27, 1 }
 0x6ec   : > { %v1011_v29 = vadd.f32 %v1010_v28, %v1009_v27 }
 0x6ee   : > { %1277 = vpush %v1011_v29 }
 0x71f   : > { %s1278_s18 = spop %1277 }
 0x720   : > { %s1014_s15 = sadd.f32 %s1278_s18, %s1013_s12 }
 0x722   : > { %s1015_s16 = smul.f32 0.5, %s1014_s15 }
 0x724   : > { %s1016_s21 = smul.f32 0.015625, %s1015_s16 }
 0x726   : > { %1018 = sst [smem:[#allocation19]] %s1016_s21 }
 0x727 PF: > { %p1309_p4 = scmp.eq.s32.totalorder %s1835_s29, 15  ;;  %s2285_s30 = sld [smem:[#allocation35_spill]] }
 0x728   : > { %s2286_s5 = sld [smem:[#allocation36_spill]]  ;;  %s1749_s27 = smov [#allocation19]  }
 0x729   : > { %s1750_s6 = smov [#allocation20]  }
 0x72d   : > { %s1030_s9 = sshll.u32 %s2285_s30, 4  ;;  %s1031_s9 = int_to_ptr.hbm [resolvable:$true] %s1030_s9 }
 0x72e   : > { %s1040_s24 = sshll.u32 %s2286_s5, 4  ;;  %s1041_s24 = int_to_ptr.hbm [resolvable:$true] %s1040_s24 }
 0x72f   : > { %1288 = dma.smem_to_hbm (%p1309_p4), %s1749_s27, 16, %s1031_s9, [#allocation13]  }
 0x730   : > { %1290 = dma.smem_to_hbm (%p1309_p4), %s1750_s6, 16, %s1041_s24, [#allocation21]  }
 0x731   : > { %1685 = dma.done.wait (%p1309_p4), [#allocation13], 16  }
 0x732   : > { %1687 = vsyncadd (%p1309_p4), [#allocation13], 4294967280 }
 0x733   : > { %1689 = dma.done.wait (%p1309_p4), [#allocation21], 16  }
 0x734   : > { %1691 = vsyncadd (%p1309_p4), [#allocation21], 4294967280 }
 0x735   : > { %1054 = sfence }
 0x736 PF: > { %s27_s28 = sadd.s32 1, %s1734_s28   ;;  %s2287_s29 = sld [smem:[#allocation32_spill]] }
 0x737   : > { %p24_p7 = scmp.ge.s32.totalorder %s27_s28, 18   ;;  %s2288_s25 = sld [smem:[#allocation29_spill]] }
 0x738   : > { %s2289_s13 = sld [smem:[#allocation30_spill]]  ;;  %s2291_s18 = smov %s1698_s19 }
 0x739   : > { %s2290_s27 = sld [smem:[#allocation31_spill]]  ;;  %s2292_s19 = smov %s1702_s20 }
 0x73a   : > { %s2294_s21 = smov %s1710_s22  ;;  %s2295_s22 = smov %s1714_s23 }
 0x73b   : > { %s2296_s23 = smov %s1927_s4  ;;  %s2297_s24 = smov %s1726_s26 }
 0x73c   : > { %s2293_s20 = smov %s2287_s29  ;;  %26 = sbr.rel (!%p24_p7) target bundleno = 18 (0x12), region = 151 }
 0x73e   : > { %s2298_s26 = smov %s2289_s13 }
 0x741   :  { %1060 = vsyncpa [#allocation12], 1 }
 0x742   :  { %1062 = vsyncpa [#allocation12 + $0x1], 1 }
 0x743   :  { %1063 = vsyncpa [#allocation15], 1 }
 0x744   :  { %1065 = vsyncpa [#allocation15 + $0x1], 1 }
 0x745   :  { %1066 = vsyncpa [#allocation18], 1 }
 0x746   :  { %1068 = vsyncpa [#allocation18 + $0x1], 1 }
 0x747   :  { %1069 = vsyncpa [#allocation13], 1 }
 0x748   :  { %1071 = vsyncpa [#allocation13 + $0x1], 1 }
 0x749   :  { %1072 = vsyncpa [#allocation21], 1 }

</bundles_post_ra>
